<compile_context>
chip_gen: v7x
topology: tpu7x:2x2x1
jax: 0.10.0
libtpu: 0.0.40
codegen_flags: <defaults>
</compile_context>

<pallas_src>
import functools

import jax
import jax.numpy as jnp
from jax import lax
from jax.experimental import pallas as pl
from jax.experimental.pallas import tpu as pltpu


def cbow_kernel(idx_ref, emb_ref, qw1_ref, s1_ref, b1_ref,
                qw2_ref, s2_ref, b2_ref, out_ref):
    idxv = idx_ref[...]                                   # [TB, CTX] int32
    tb, ctx = idxv.shape
    v = emb_ref.shape[0]

    # --- embedding bag: sum(self.embeddings(inputs)) per row -----------------
    # counts[b, t] = #{i : idx[b, i] == t}.  Built with a single hoisted
    # (1, V) lane iota and CTX statically-unrolled 2-D compares accumulated
    # in f32 [TB, V]; cast to bf16 once before the MXU dot.  OOB-safe by
    # construction (out-of-range ids contribute nothing).
    iota_v = lax.broadcasted_iota(jnp.int32, (1, v), 1)          # hoisted once
    counts = jnp.zeros((tb, v), jnp.float32)
    for i in range(ctx):                                         # CTX is small
        counts = counts + (idxv[:, i:i + 1] == iota_v).astype(jnp.float32)

    embeds = jnp.dot(counts.astype(emb_ref.dtype), emb_ref[...],
                     preferred_element_type=jnp.float32)         # [TB, E] f32

    # --- out = relu(self.proj(embeds)) ---------------------------------------
    # int8 weights dequantized in VMEM; matmul bf16 x bf16 -> f32 acc; the
    # per-output-channel scale is applied to the f32 result (exact).
    w1 = qw1_ref[...].astype(jnp.float32).astype(jnp.bfloat16)   # exact ints
    h = jnp.dot(embeds.astype(jnp.bfloat16), w1,
                preferred_element_type=jnp.float32)
    h = h * s1_ref[...] + b1_ref[...]                            # [TB, H] f32
    h = jnp.maximum(h, 0.0)

    # --- out = self.output(h) ------------------------------------------------
    w2 = qw2_ref[...].astype(jnp.float32).astype(jnp.bfloat16)
    logits = jnp.dot(h.astype(jnp.bfloat16), w2,
                     preferred_element_type=jnp.float32)
    logits = logits * s2_ref[...] + b2_ref[...]                  # [TB, V] f32

    # --- log_softmax(dim=-1) in f32 ------------------------------------------
    m = jnp.max(logits, axis=-1, keepdims=True)
    shifted = logits - m
    lse = jnp.log(jnp.sum(jnp.exp(shifted), axis=-1, keepdims=True))
    out_ref[...] = (shifted - lse).astype(out_ref.dtype)


def _quantize_per_col(w):
    """Symmetric per-output-channel int8 quantization of an [in, out] matrix."""
    s = jnp.max(jnp.abs(w), axis=0, keepdims=True) / 127.0       # [1, out]
    s = jnp.where(s == 0, 1.0, s).astype(jnp.float32)
    q = jnp.clip(jnp.round(w / s), -127, 127).astype(jnp.int8)
    return q, s


def _pick_block_b(B):
    """Fill the MXU M dim for large batches; one grid step for tiny ones."""
    if B % 256 == 0 and B >= 512:
        return 256
    if B % 128 == 0 and B >= 256:
        return 128
    return B


def cbow_forward(idx, emb, w1, b1, w2, b2, *, block_b=None,
                 out_dtype=jnp.float32):
    """Batched CBOW forward. idx: int32 [B, CTX]; returns [B, V] log-probs."""
    B, CTX = idx.shape
    V, E = emb.shape
    H = w1.shape[1]

    if block_b is None:
        block_b = _pick_block_b(B)
    assert B % block_b == 0, "batch must be a multiple of block_b"
    num_tiles = B // block_b

    # Weight streaming: emb in bf16, w1/w2 weight-only int8 (+ f32 scales).
    emb_w = emb.astype(jnp.bfloat16)
    q1, s1 = _quantize_per_col(w1.astype(jnp.float32))
    q2, s2 = _quantize_per_col(w2.astype(jnp.float32))
    b1_w = b1.astype(jnp.float32)
    b2_w = b2.astype(jnp.float32)
    idx = idx.astype(jnp.int32)

    grid = (num_tiles,)
    # Only shard across TensorCores when each core gets >=128 rows per weight
    # fetch; a tiny grid with "parallel" would double-stream the weights.
    dims = ("parallel",) if (num_tiles >= 2 and block_b >= 128) else ("arbitrary",)

    out_bytes = jnp.dtype(out_dtype).itemsize
    bytes_accessed = (
        idx.size * 4
        + emb_w.size * 2 + q1.size * 1 + q2.size * 1
        + (s1.size + b1_w.size + s2.size + b2_w.size) * 4
        + B * V * out_bytes
    )
    cost = pl.CostEstimate(
        flops=2 * B * (V * E + E * H + H * V),
        transcendentals=B * (V + 1),
        bytes_accessed=bytes_accessed,
    )

    return pl.pallas_call(
        cbow_kernel,
        out_shape=jax.ShapeDtypeStruct((B, V), out_dtype),
        grid_spec=pltpu.PrefetchScalarGridSpec(
            num_scalar_prefetch=0,
            grid=grid,
            in_specs=[
                pl.BlockSpec((block_b, CTX), lambda i: (i, 0)),  # token ids
                pl.BlockSpec((V, E), lambda i: (0, 0)),          # emb (resident)
                pl.BlockSpec((E, H), lambda i: (0, 0)),          # q1  (resident)
                pl.BlockSpec((1, H), lambda i: (0, 0)),          # s1
                pl.BlockSpec((1, H), lambda i: (0, 0)),          # b1
                pl.BlockSpec((H, V), lambda i: (0, 0)),          # q2  (resident)
                pl.BlockSpec((1, V), lambda i: (0, 0)),          # s2
                pl.BlockSpec((1, V), lambda i: (0, 0)),          # b2
            ],
            out_specs=pl.BlockSpec((block_b, V), lambda i: (i, 0)),
        ),
        compiler_params=pltpu.CompilerParams(dimension_semantics=dims),
        cost_estimate=cost,
    )(idx, emb_w, q1, s1, b1_w, q2, s2, b2_w)


def reference_forward(idx, emb, w1, b1, w2, b2):
    """Pure-JAX reference using the same int8-weight / bf16 / f32-acc math."""
    emb_w = emb.astype(jnp.bfloat16)
    q1, s1 = _quantize_per_col(w1.astype(jnp.float32))
    q2, s2 = _quantize_per_col(w2.astype(jnp.float32))
    w1q = q1.astype(jnp.float32).astype(jnp.bfloat16)
    w2q = q2.astype(jnp.float32).astype(jnp.bfloat16)

    embeds = jnp.sum(emb_w[idx].astype(jnp.float32), axis=1)          # [B, E]
    h = jnp.dot(embeds.astype(jnp.bfloat16), w1q,
                preferred_element_type=jnp.float32) * s1 + b1
    h = jnp.maximum(h, 0.0)
    logits = jnp.dot(h.astype(jnp.bfloat16), w2q,
                     preferred_element_type=jnp.float32) * s2 + b2
    return jax.nn.log_softmax(logits, axis=-1)


if __name__ == "__main__":
    VOCAB = 256
    EMBED = 64
    HIDDEN = 2048   # fixed by the module (nn.Linear(embedding_dim, 2048))
    CTX = 8
    BATCH = 16      # batch of independent contexts; each row == one forward()

    key = jax.random.PRNGKey(0)
    k_idx, k_emb, k_w1, k_b1, k_w2, k_b2 = jax.random.split(key, 6)

    idx = jax.random.randint(k_idx, (BATCH, CTX), 0, VOCAB, dtype=jnp.int32)

    # Deterministic parameter init (roughly matching PyTorch default scales).
    emb = jax.random.normal(k_emb, (VOCAB, EMBED), jnp.float32)
    lim1 = 1.0 / (EMBED ** 0.5)
    w1 = jax.random.uniform(k_w1, (EMBED, HIDDEN), jnp.float32, -lim1, lim1)
    b1 = jax.random.uniform(k_b1, (1, HIDDEN), jnp.float32, -lim1, lim1)
    lim2 = 1.0 / (HIDDEN ** 0.5)
    w2 = jax.random.uniform(k_w2, (HIDDEN, VOCAB), jnp.float32, -lim2, lim2)
    b2 = jax.random.uniform(k_b2, (1, VOCAB), jnp.float32, -lim2, lim2)

    # block_b auto-picks B (=> grid of a single step for this tiny batch).
    out = cbow_forward(idx, emb, w1, b1, w2, b2)
    out = jax.block_until_ready(out)

    ref = reference_forward(idx, emb, w1, b1, w2, b2)
    assert out.shape == (BATCH, VOCAB)
    assert jnp.allclose(out, ref, atol=2e-3, rtol=2e-3)
    # Sanity: each row is a valid log-prob distribution.
    assert jnp.allclose(jnp.sum(jnp.exp(out), axis=-1), 1.0, atol=1e-3)

    print("KERNEL_OK")
</pallas_src>

<mosaic_0001>
module attributes {stable_mosaic.version = 11 : i64} {
  func.func @cbow_kernel(%arg0: i32, %arg1: memref<16x8xi32, #tpu.memory_space<vmem>>, %arg2: memref<256x64xbf16, #tpu.memory_space<vmem>>, %arg3: memref<64x2048xi8, #tpu.memory_space<vmem>>, %arg4: memref<1x2048xf32, #tpu.memory_space<vmem>>, %arg5: memref<1x2048xf32, #tpu.memory_space<vmem>>, %arg6: memref<2048x256xi8, #tpu.memory_space<vmem>>, %arg7: memref<1x256xf32, #tpu.memory_space<vmem>>, %arg8: memref<1x256xf32, #tpu.memory_space<vmem>>, %arg9: memref<16x256xf32, #tpu.memory_space<vmem>>) attributes {dimension_semantics = [#tpu.dimension_semantics<arbitrary>], iteration_bounds = array<i64: 1>, scalar_prefetch = 0 : i64, scratch_operands = 0 : i64, tpu.core_type = #tpu.core_type<tc>, window_params = [{transform_indices = @transform_0, window_bounds = array<i64: 16, 8>}, {pipeline_mode = #tpu.pipeline_mode<synchronous>, transform_indices = @transform_1, window_bounds = array<i64: 256, 64>}, {pipeline_mode = #tpu.pipeline_mode<synchronous>, transform_indices = @transform_2, window_bounds = array<i64: 64, 2048>}, {pipeline_mode = #tpu.pipeline_mode<synchronous>, transform_indices = @transform_3, window_bounds = array<i64: 1, 2048>}, {pipeline_mode = #tpu.pipeline_mode<synchronous>, transform_indices = @transform_4, window_bounds = array<i64: 1, 2048>}, {pipeline_mode = #tpu.pipeline_mode<synchronous>, transform_indices = @transform_5, window_bounds = array<i64: 2048, 256>}, {pipeline_mode = #tpu.pipeline_mode<synchronous>, transform_indices = @transform_6, window_bounds = array<i64: 1, 256>}, {pipeline_mode = #tpu.pipeline_mode<synchronous>, transform_indices = @transform_7, window_bounds = array<i64: 1, 256>}, {transform_indices = @transform_8, window_bounds = array<i64: 16, 256>}]} {
    %c0 = arith.constant 0 : index
    %c0_0 = arith.constant 0 : index
    %0 = vector.load %arg1[%c0, %c0_0] : memref<16x8xi32, #tpu.memory_space<vmem>>, vector<16x8xi32>
    %1 = tpu.iota {dimensions = array<i32: 1>} : vector<1x256xi32>
    %cst = arith.constant 0.000000e+00 : f32
    %2 = vector.broadcast %cst : f32 to vector<16x256xf32>
    %3 = vector.extract_strided_slice %0 {offsets = [0, 0], sizes = [16, 1], strides = [1, 1]} : vector<16x8xi32> to vector<16x1xi32>
    %4 = vector.broadcast %3 : vector<16x1xi32> to vector<16x256xi32>
    %5 = vector.broadcast %1 : vector<1x256xi32> to vector<16x256xi32>
    %6 = arith.cmpi eq, %4, %5 : vector<16x256xi32>
    %7 = arith.extui %6 : vector<16x256xi1> to vector<16x256xi32>
    %8 = arith.sitofp %7 : vector<16x256xi32> to vector<16x256xf32>
    %9 = arith.addf %2, %8 : vector<16x256xf32>
    %10 = vector.extract_strided_slice %0 {offsets = [0, 1], sizes = [16, 1], strides = [1, 1]} : vector<16x8xi32> to vector<16x1xi32>
    %11 = vector.broadcast %10 : vector<16x1xi32> to vector<16x256xi32>
    %12 = vector.broadcast %1 : vector<1x256xi32> to vector<16x256xi32>
    %13 = arith.cmpi eq, %11, %12 : vector<16x256xi32>
    %14 = arith.extui %13 : vector<16x256xi1> to vector<16x256xi32>
    %15 = arith.sitofp %14 : vector<16x256xi32> to vector<16x256xf32>
    %16 = arith.addf %9, %15 : vector<16x256xf32>
    %17 = vector.extract_strided_slice %0 {offsets = [0, 2], sizes = [16, 1], strides = [1, 1]} : vector<16x8xi32> to vector<16x1xi32>
    %18 = vector.broadcast %17 : vector<16x1xi32> to vector<16x256xi32>
    %19 = vector.broadcast %1 : vector<1x256xi32> to vector<16x256xi32>
    %20 = arith.cmpi eq, %18, %19 : vector<16x256xi32>
    %21 = arith.extui %20 : vector<16x256xi1> to vector<16x256xi32>
    %22 = arith.sitofp %21 : vector<16x256xi32> to vector<16x256xf32>
    %23 = arith.addf %16, %22 : vector<16x256xf32>
    %24 = vector.extract_strided_slice %0 {offsets = [0, 3], sizes = [16, 1], strides = [1, 1]} : vector<16x8xi32> to vector<16x1xi32>
    %25 = vector.broadcast %24 : vector<16x1xi32> to vector<16x256xi32>
    %26 = vector.broadcast %1 : vector<1x256xi32> to vector<16x256xi32>
    %27 = arith.cmpi eq, %25, %26 : vector<16x256xi32>
    %28 = arith.extui %27 : vector<16x256xi1> to vector<16x256xi32>
    %29 = arith.sitofp %28 : vector<16x256xi32> to vector<16x256xf32>
    %30 = arith.addf %23, %29 : vector<16x256xf32>
    %31 = vector.extract_strided_slice %0 {offsets = [0, 4], sizes = [16, 1], strides = [1, 1]} : vector<16x8xi32> to vector<16x1xi32>
    %32 = vector.broadcast %31 : vector<16x1xi32> to vector<16x256xi32>
    %33 = vector.broadcast %1 : vector<1x256xi32> to vector<16x256xi32>
    %34 = arith.cmpi eq, %32, %33 : vector<16x256xi32>
    %35 = arith.extui %34 : vector<16x256xi1> to vector<16x256xi32>
    %36 = arith.sitofp %35 : vector<16x256xi32> to vector<16x256xf32>
    %37 = arith.addf %30, %36 : vector<16x256xf32>
    %38 = vector.extract_strided_slice %0 {offsets = [0, 5], sizes = [16, 1], strides = [1, 1]} : vector<16x8xi32> to vector<16x1xi32>
    %39 = vector.broadcast %38 : vector<16x1xi32> to vector<16x256xi32>
    %40 = vector.broadcast %1 : vector<1x256xi32> to vector<16x256xi32>
    %41 = arith.cmpi eq, %39, %40 : vector<16x256xi32>
    %42 = arith.extui %41 : vector<16x256xi1> to vector<16x256xi32>
    %43 = arith.sitofp %42 : vector<16x256xi32> to vector<16x256xf32>
    %44 = arith.addf %37, %43 : vector<16x256xf32>
    %45 = vector.extract_strided_slice %0 {offsets = [0, 6], sizes = [16, 1], strides = [1, 1]} : vector<16x8xi32> to vector<16x1xi32>
    %46 = vector.broadcast %45 : vector<16x1xi32> to vector<16x256xi32>
    %47 = vector.broadcast %1 : vector<1x256xi32> to vector<16x256xi32>
    %48 = arith.cmpi eq, %46, %47 : vector<16x256xi32>
    %49 = arith.extui %48 : vector<16x256xi1> to vector<16x256xi32>
    %50 = arith.sitofp %49 : vector<16x256xi32> to vector<16x256xf32>
    %51 = arith.addf %44, %50 : vector<16x256xf32>
    %52 = vector.extract_strided_slice %0 {offsets = [0, 7], sizes = [16, 1], strides = [1, 1]} : vector<16x8xi32> to vector<16x1xi32>
    %53 = vector.broadcast %52 : vector<16x1xi32> to vector<16x256xi32>
    %54 = vector.broadcast %1 : vector<1x256xi32> to vector<16x256xi32>
    %55 = arith.cmpi eq, %53, %54 : vector<16x256xi32>
    %56 = arith.extui %55 : vector<16x256xi1> to vector<16x256xi32>
    %57 = arith.sitofp %56 : vector<16x256xi32> to vector<16x256xf32>
    %58 = arith.addf %51, %57 : vector<16x256xf32>
    %59 = arith.truncf %58 : vector<16x256xf32> to vector<16x256xbf16>
    %c0_1 = arith.constant 0 : index
    %c0_2 = arith.constant 0 : index
    %60 = vector.load %arg2[%c0_1, %c0_2] : memref<256x64xbf16, #tpu.memory_space<vmem>>, vector<256x64xbf16>
    %cst_3 = arith.constant dense<0.000000e+00> : vector<16x64xf32>
    %61 = tpu.matmul %59, %60, %cst_3 {dimension_numbers = #tpu.dot_dimension_numbers<[1], [0], [0], [1], [0, 0, 1, 1], [], []>} : vector<16x256xbf16>, vector<256x64xbf16>, vector<16x64xf32> -> vector<16x64xf32>
    %c0_4 = arith.constant 0 : index
    %c0_5 = arith.constant 0 : index
    %62 = vector.load %arg3[%c0_4, %c0_5] : memref<64x2048xi8, #tpu.memory_space<vmem>>, vector<64x2048xi8>
    %63 = arith.sitofp %62 : vector<64x2048xi8> to vector<64x2048xf32>
    %64 = arith.truncf %63 : vector<64x2048xf32> to vector<64x2048xbf16>
    %65 = arith.truncf %61 : vector<16x64xf32> to vector<16x64xbf16>
    %cst_6 = arith.constant dense<0.000000e+00> : vector<16x2048xf32>
    %66 = tpu.matmul %65, %64, %cst_6 {dimension_numbers = #tpu.dot_dimension_numbers<[1], [0], [0], [1], [0, 0, 1, 1], [], []>} : vector<16x64xbf16>, vector<64x2048xbf16>, vector<16x2048xf32> -> vector<16x2048xf32>
    %c0_7 = arith.constant 0 : index
    %c0_8 = arith.constant 0 : index
    %67 = vector.load %arg4[%c0_7, %c0_8] : memref<1x2048xf32, #tpu.memory_space<vmem>>, vector<1x2048xf32>
    %68 = vector.broadcast %67 : vector<1x2048xf32> to vector<16x2048xf32>
    %69 = arith.mulf %66, %68 : vector<16x2048xf32>
    %c0_9 = arith.constant 0 : index
    %c0_10 = arith.constant 0 : index
    %70 = vector.load %arg5[%c0_9, %c0_10] : memref<1x2048xf32, #tpu.memory_space<vmem>>, vector<1x2048xf32>
    %71 = vector.broadcast %70 : vector<1x2048xf32> to vector<16x2048xf32>
    %72 = arith.addf %69, %71 : vector<16x2048xf32>
    %cst_11 = arith.constant 0.000000e+00 : f32
    %73 = vector.broadcast %cst_11 : f32 to vector<16x2048xf32>
    %74 = arith.maximumf %72, %73 : vector<16x2048xf32>
    %c0_12 = arith.constant 0 : index
    %c0_13 = arith.constant 0 : index
    %75 = vector.load %arg6[%c0_12, %c0_13] : memref<2048x256xi8, #tpu.memory_space<vmem>>, vector<2048x256xi8>
    %76 = arith.sitofp %75 : vector<2048x256xi8> to vector<2048x256xf32>
    %77 = arith.truncf %76 : vector<2048x256xf32> to vector<2048x256xbf16>
    %78 = arith.truncf %74 : vector<16x2048xf32> to vector<16x2048xbf16>
    %cst_14 = arith.constant dense<0.000000e+00> : vector<16x256xf32>
    %79 = tpu.matmul %78, %77, %cst_14 {dimension_numbers = #tpu.dot_dimension_numbers<[1], [0], [0], [1], [0, 0, 1, 1], [], []>} : vector<16x2048xbf16>, vector<2048x256xbf16>, vector<16x256xf32> -> vector<16x256xf32>
    %c0_15 = arith.constant 0 : index
    %c0_16 = arith.constant 0 : index
    %80 = vector.load %arg7[%c0_15, %c0_16] : memref<1x256xf32, #tpu.memory_space<vmem>>, vector<1x256xf32>
    %81 = vector.broadcast %80 : vector<1x256xf32> to vector<16x256xf32>
    %82 = arith.mulf %79, %81 : vector<16x256xf32>
    %c0_17 = arith.constant 0 : index
    %c0_18 = arith.constant 0 : index
    %83 = vector.load %arg8[%c0_17, %c0_18] : memref<1x256xf32, #tpu.memory_space<vmem>>, vector<1x256xf32>
    %84 = vector.broadcast %83 : vector<1x256xf32> to vector<16x256xf32>
    %85 = arith.addf %82, %84 : vector<16x256xf32>
    %cst_19 = arith.constant dense<0xFF800000> : vector<16xf32>
    %86 = vector.multi_reduction <maximumf>, %85, %cst_19 [1] : vector<16x256xf32> to vector<16xf32>
    %87 = vector.shape_cast %86 : vector<16xf32> to vector<16x1xf32>
    %88 = vector.broadcast %87 : vector<16x1xf32> to vector<16x256xf32>
    %89 = arith.subf %85, %88 : vector<16x256xf32>
    %90 = math.exp %89 : vector<16x256xf32>
    %cst_20 = arith.constant dense<0.000000e+00> : vector<16xf32>
    %91 = vector.multi_reduction <add>, %90, %cst_20 [1] : vector<16x256xf32> to vector<16xf32>
    %92 = vector.shape_cast %91 : vector<16xf32> to vector<16x1xf32>
    %93 = math.log %92 : vector<16x1xf32>
    %94 = vector.broadcast %93 : vector<16x1xf32> to vector<16x256xf32>
    %95 = arith.subf %89, %94 : vector<16x256xf32>
    %c0_21 = arith.constant 0 : index
    %c0_22 = arith.constant 0 : index
    %96 = vector.load %arg9[%c0_21, %c0_22] : memref<16x256xf32, #tpu.memory_space<vmem>>, vector<16x256xf32>
    tpu.vector_store %arg9[%c0_21, %c0_22], %95 {strides = array<i32>} : memref<16x256xf32, #tpu.memory_space<vmem>>, vector<16x256xf32>,
    return
  }
  func.func @transform_0(%arg0: i32) -> (i32, i32) {
    %c0_i32 = arith.constant 0 : i32
    %c0_i32_0 = arith.constant 0 : i32
    return %arg0, %c0_i32 : i32, i32
  }
  func.func @transform_1(%arg0: i32) -> (i32, i32) {
    %c0_i32 = arith.constant 0 : i32
    %c0_i32_0 = arith.constant 0 : i32
    %c0_i32_1 = arith.constant 0 : i32
    return %c0_i32, %c0_i32_0 : i32, i32
  }
  func.func @transform_2(%arg0: i32) -> (i32, i32) {
    %c0_i32 = arith.constant 0 : i32
    %c0_i32_0 = arith.constant 0 : i32
    %c0_i32_1 = arith.constant 0 : i32
    return %c0_i32, %c0_i32_0 : i32, i32
  }
  func.func @transform_3(%arg0: i32) -> (i32, i32) {
    %c0_i32 = arith.constant 0 : i32
    %c0_i32_0 = arith.constant 0 : i32
    %c0_i32_1 = arith.constant 0 : i32
    return %c0_i32, %c0_i32_0 : i32, i32
  }
  func.func @transform_4(%arg0: i32) -> (i32, i32) {
    %c0_i32 = arith.constant 0 : i32
    %c0_i32_0 = arith.constant 0 : i32
    %c0_i32_1 = arith.constant 0 : i32
    return %c0_i32, %c0_i32_0 : i32, i32
  }
  func.func @transform_5(%arg0: i32) -> (i32, i32) {
    %c0_i32 = arith.constant 0 : i32
    %c0_i32_0 = arith.constant 0 : i32
    %c0_i32_1 = arith.constant 0 : i32
    return %c0_i32, %c0_i32_0 : i32, i32
  }
  func.func @transform_6(%arg0: i32) -> (i32, i32) {
    %c0_i32 = arith.constant 0 : i32
    %c0_i32_0 = arith.constant 0 : i32
    %c0_i32_1 = arith.constant 0 : i32
    return %c0_i32, %c0_i32_0 : i32, i32
  }
  func.func @transform_7(%arg0: i32) -> (i32, i32) {
    %c0_i32 = arith.constant 0 : i32
    %c0_i32_0 = arith.constant 0 : i32
    %c0_i32_1 = arith.constant 0 : i32
    return %c0_i32, %c0_i32_0 : i32, i32
  }
  func.func @transform_8(%arg0: i32) -> (i32, i32) {
    %c0_i32 = arith.constant 0 : i32
    %c0_i32_0 = arith.constant 0 : i32
    return %arg0, %c0_i32 : i32, i32
  }
}

</mosaic_0001>

<bundles_post_ra>
// kernel: tpu_custom_call.1
= control target key start
LH: loop header
LB: loop body
LE: loop exit
PB: predicated region body
PF: predicated region fallthrough
CT: control target
= control target key end

     0   :  { %13 = vsyncpa [#allocation3], 0  ;;  %s2674_s0 = inlined_call_operand.vmem [shape: s32[16,8], index: 0, kind: input, shape index: {}]   ;;  %s2675_s1 = inlined_call_operand.vmem [shape: bf16[256,64], index: 1, kind: input, shape index: {}]   ;;  %s2676_s2 = inlined_call_operand.hbm [shape: s8[64,2048], index: 2, kind: input, shape index: {}]   ;;  %s2677_s3 = inlined_call_operand.vmem [shape: f32[1,2048], index: 3, kind: input, shape index: {}]   ;;  %s2678_s4 = inlined_call_operand.vmem [shape: f32[1,2048], index: 4, kind: input, shape index: {}]   ;;  %s2679_s5 = inlined_call_operand.hbm [shape: s8[2048,256], index: 5, kind: input, shape index: {}]   ;;  %s2680_s6 = inlined_call_operand.vmem [shape: f32[1,256], index: 6, kind: input, shape index: {}]   ;;  %s2681_s7 = inlined_call_operand.vmem [shape: f32[1,256], index: 7, kind: input, shape index: {}]   ;;  %s2682_s8 = inlined_call_operand.hbm [shape: f32[16,256], index: 8, kind: output, shape index: {}]  }
   0x1   :  { %14 = vsyncpa [#allocation6], 0 }
   0x2   :  { %15 = vsyncpa [#allocation4], 0  ;;  %s2185_s27 = smov [#allocation2]   ;;  %s2113_s9 = scalar_lea.hbm %s2676_s2, 4096 }
   0x3   :  { %s25_s28 = sshll.u32 %s2185_s27, 4  ;;  %p2114_p0 = scmp.ne.s32.totalorder %s2676_s2, %s2113_s9  ;;  %s26_s28 = int_to_ptr.vmem [resolvable:$true] %s25_s28 }
   0x4   :  { %p2117_p1 = scmp.lt.u32.totalorder %s2113_s9, %s2676_s2 }
   0x6   :  { %p2119_p2 = pnand %p2117_p1, %p2114_p0 }
   0x8   :  { %2122 = shalt.err (!%p2119_p2)
}
   0x9   :  { %s2123_s14 = scalar_lea.vmem %s26_s28, 4096  ;;  %p2128_p4 = scmp.lt.s32.totalorder %s26_s28, %s26_s28 }
   0xa   :  { %p2124_p3 = scmp.ne.s32.totalorder %s26_s28, %s2123_s14  ;;  %p2129_p5 = scmp.lt.s32.totalorder %s2123_s14, %s2123_s14 }
   0xc   :  { %p2130_p6 = por %p2129_p5, %p2128_p4 }
   0xe   :  { %p2131_p7 = pnand %p2130_p6, %p2124_p3 }
  0x10   :  { %2134 = shalt.err (!%p2131_p7)
}
  0x11   :  { %s2186_s15 = smov 2048   ;;  %s2187_s16 = smov 128  }
  0x12   :  { %31 = dma.hbm_to_vmem [thread:$0]  %s2676_s2, 4096, %s26_s28, [#allocation3], %s2186_s15, %s2186_s15, %s2187_s16  }
  0x13   :  { %s2188_s19 = smov [#allocation5]   ;;  %s2135_s23 = scalar_lea.hbm %s2679_s5, 16384 }
  0x14   :  { %s41_s20 = sshll.u32 %s2188_s19, 4  ;;  %p2136_p8 = scmp.ne.s32.totalorder %s2679_s5, %s2135_s23  ;;  %s42_s20 = int_to_ptr.vmem [resolvable:$true] %s41_s20 }
  0x15   :  { %p2139_p9 = scmp.lt.u32.totalorder %s2135_s23, %s2679_s5 }
  0x17   :  { %p2141_p10 = pnand %p2139_p9, %p2136_p8 }
  0x19   :  { %2144 = shalt.err (!%p2141_p10)
}
  0x1a   :  { %s2145_s29 = scalar_lea.vmem %s42_s20, 16384  ;;  %p2150_p12 = scmp.lt.s32.totalorder %s42_s20, %s42_s20 }
  0x1b   :  { %p2146_p11 = scmp.ne.s32.totalorder %s42_s20, %s2145_s29  ;;  %p2151_p13 = scmp.lt.s32.totalorder %s2145_s29, %s2145_s29 }
  0x1d   :  { %p2152_p0 = por %p2151_p13, %p2150_p12 }
  0x1f   :  { %p2153_p1 = pnand %p2152_p0, %p2146_p11 }
  0x21   :  { %2156 = shalt.err (!%p2153_p1)
}
  0x22   :  { %s2189_s2 = smov 256   ;;  %s2190_s28 = smov 16  }
  0x23   :  { %47 = dma.hbm_to_vmem [thread:$0]  %s2679_s5, 16384, %s42_s20, [#allocation6], %s2189_s2, %s2189_s2, %s2190_s28  }
  0x24   :  { %2179 = dma.done.wait [#allocation3], 4096  }
  0x25   :  { %2180 = vsyncadd [#allocation3], 4294963200 }
  0x26   :  { %2181 = dma.done.wait [#allocation6], 16384  }
  0x27   :  { %2182 = vsyncadd [#allocation6], 4294950912  ;;  %v2191_v0 = vmov 1   ;;  %v2192_v1 = vmov 0   ;;  %v59_v2 = vld [vmem:[%s2674_s0] sm:$0xff]  ;;  %v60_v3 = vld [vmem:[%s2674_s0 + $0x8] sm:$0xff]  ;;  %v61_v39 = vlaneseq }
  0x28   :  { %2073 = vset.pattern.permute.xlu1 %v2191_v0  ;;  %2072 = vset.pattern.permute.xlu0 %v2192_v1  ;;  %v2193_v4 = vmov 2   ;;  %v2194_v5 = vmov 3   ;;  %v2085_v6 = vld [vmem:[%s2675_s1 + $0x40] sm:$0xff]   ;;  %v2195_v8 = vmov 4   ;;  %v2196_v9 = vmov 5   ;;  %v2087_v10 = vld [vmem:[%s2675_s1 + $0x48] sm:$0xff]  }
  0x29   :  { %544 = vmatprep.mubr.bf16.mxu1 %v2192_v1  ;;  %87 = vperm.xlu1 %2073, %v59_v2   ;;  %v2086_v7 = vld [vmem:[%s2675_s1] sm:$0xff]   ;;  %v2088_v11 = vld [vmem:[%s2675_s1 + $0x8] sm:$0xff]   ;;  %v2197_v12 = vmov 6   ;;  %v2089_v13 = vld [vmem:[%s2675_s1 + $0x50] sm:$0xff]   ;;  %v2198_v17 = vmov 7   ;;  %v2336_v41 = vand.u32 127, %v61_v39 }
  0x2a   :  { %65 = vperm.xlu0 %2072, %v59_v2   ;;  %2006 = vmatprep.subr.bf16.mxu0 %v2085_v6  ;;  %v2090_v14 = vld [vmem:[%s2675_s1 + $0x10] sm:$0xff]   ;;  %v2091_v15 = vld [vmem:[%s2675_s1 + $0x58] sm:$0xff]   ;;  %v2093_v18 = vld [vmem:[%s2675_s1 + $0x60] sm:$0xff]   ;;  %v2199_v48 = vmov 0.0  }
  0x2b   :  { %2007 = vmatpush3.bf16.msra.mxu0 %v2086_v7  ;;  %v2092_v16 = vld [vmem:[%s2675_s1 + $0x18] sm:$0xff]   ;;  %v2094_v19 = vld [vmem:[%s2675_s1 + $0x20] sm:$0xff]   ;;  %v2095_v20 = vld [vmem:[%s2675_s1 + $0x68] sm:$0xff]   ;;  %v2339_v44 = vadd.s32 128, %v2336_v41 }
  0x2c   :  { %2008 = vmatprep.subr.bf16.mxu0 %v2087_v10  ;;  %v2096_v21 = vld [vmem:[%s2675_s1 + $0x28] sm:$0xff]   ;;  %v2097_v22 = vld [vmem:[%s2675_s1 + $0x70] sm:$0xff]   ;;  %v2099_v24 = vld [vmem:[%s2675_s1 + $0x78] sm:$0xff]  }
  0x2d   :  { %90 = vperm.xlu1 %2073, %v60_v3   ;;  %v2098_v23 = vld [vmem:[%s2675_s1 + $0x30] sm:$0xff]   ;;  %v2100_v25 = vld [vmem:[%s2675_s1 + $0x38] sm:$0xff]   ;;  %v412_v26 = vld [vmem:[#allocation2 + $0x8] sm:$0xff] }
  0x2e   :  { %68 = vperm.xlu0 %2072, %v60_v3   ;;  %v2329_v27 = vld [vmem:[#allocation2 + $0x28] sm:$0xff]  ;;  %v411_v28 = vld [vmem:[#allocation2] sm:$0xff]  ;;  %v444_v29 = vunpack.c.l.s8.bf16 %v412_v26  ;;  %v460_v30 = vunpack.c.h.s8.bf16 %v412_v26 }
  0x2f   :  { %2009 = vmatpush3.bf16.msra.mxu0 %v2088_v11  ;;  %v448_v31 = vunpack.c.l.s8.bf16 %v2329_v27  ;;  %v443_v32 = vunpack.c.l.s8.bf16 %v411_v28  ;;  %v459_v33 = vunpack.c.h.s8.bf16 %v411_v28  ;;  %v2332_v34 = vld [vmem:[#allocation2 + $0x88] sm:$0xff] }
  0x30   :  { %2010 = vmatprep.subr.bf16.mxu0 %v2089_v13  ;;  %512 = vmatprep.subr.bf16.mxu1 %v444_v29  ;;  %v476_v35 = vunpack.c.l.s8.bf16 %v2332_v34 }
  0x31   :  { %2075 = vset.pattern.permute.xlu1 %v2193_v4  ;;  %513 = vmatpush1.bf16.msra.mxu1 %v443_v32 }
  0x32   :  { %2074 = vset.pattern.permute.xlu0 %v2193_v4  ;;  %112 = vperm.xlu1 %2075, %v60_v3  }
  0x33   :  { %109 = vperm.xlu0 %2074, %v59_v2   ;;  %2011 = vmatpush3.bf16.msra.mxu0 %v2090_v14 }
  0x34   :  { %2012 = vmatprep.subr.bf16.mxu0 %v2091_v15  ;;  %514 = vmatprep.subr.bf16.mxu1 %v460_v30 }
  0x35   :  { %515 = vmatpush1.bf16.msra.mxu1 %v459_v33 }
  0x36   :  { %2076 = vset.pattern.permute.xlu1 %v2194_v5  ;;  %516 = vmatprep.subr.bf16.mxu1 %v476_v35 }
  0x37   :  { %2077 = vset.pattern.permute.xlu0 %v2194_v5  ;;  %131 = vperm.xlu1 %2076, %v59_v2  }
  0x38   :  { %134 = vperm.xlu0 %2077, %v60_v3   ;;  %2013 = vmatpush3.bf16.msra.mxu0 %v2092_v16 }
  0x39   :  { %2014 = vmatprep.subr.bf16.mxu0 %v2093_v18 }
  0x3b   :  { %2078 = vset.pattern.permute.xlu1 %v2195_v8 }
  0x3c   :  { %2079 = vset.pattern.permute.xlu0 %v2196_v9  ;;  %153 = vperm.xlu1 %2078, %v59_v2  }
  0x3d   :  { %175 = vperm.xlu0 %2079, %v59_v2   ;;  %2015 = vmatpush3.bf16.msra.mxu0 %v2094_v19 }
  0x3e   :  { %2016 = vmatprep.subr.bf16.mxu0 %v2095_v20 }
  0x40   :  { %156 = vperm.xlu1 %2078, %v60_v3  }
  0x41   :  { %2082 = vset.pattern.permute.xlu0 %v2197_v12  ;;  %2017 = vmatpush3.bf16.msra.mxu0 %v2096_v21 }
  0x42   :  { %200 = vperm.xlu0 %2082, %v60_v3   ;;  %2018 = vmatprep.subr.bf16.mxu0 %v2097_v22 }
  0x44   :  { %2080 = vset.pattern.permute.xlu1 %v2196_v9 }
  0x45   :  { %178 = vperm.xlu1 %2080, %v60_v3   ;;  %2019 = vmatpush3.bf16.msra.mxu0 %v2098_v23 }
  0x46   :  { %2084 = vset.pattern.permute.xlu0 %v2198_v17  ;;  %2020 = vmatprep.subr.bf16.mxu0 %v2099_v24 }
  0x49   :  { %2081 = vset.pattern.permute.xlu1 %v2197_v12  ;;  %2021 = vmatpush3.bf16.msra.mxu0 %v2100_v25 }
  0x4a   :  { %197 = vperm.xlu1 %2081, %v59_v2   ;;  %598 = vmatprep.subr.bf16.mxu0 %v448_v31 }
  0x4e   :  { %2083 = vset.pattern.permute.xlu1 %v2198_v17 }
  0x4f   :  { %219 = vperm.xlu1 %2083, %v59_v2  }
  0x53   :  { %222 = vperm.xlu1 %2083, %v60_v3  }
  0xa8   :  { %v88_v36 = vpop.permute.xlu1 %87 }
  0xa9   :  { %v66_v38 = vpop.permute.xlu0 %65  ;;  %vm92_vm0 = vcmp.eq.s32.totalorder %v88_v36, %v2336_v41  ;;  %vm93_vm1 = vcmp.eq.s32.totalorder %v88_v36, %v2339_v44 }
  0xaa   :  { %vm70_vm2 = vcmp.eq.s32.totalorder %v66_v38, %v2336_v41  ;;  %vm71_vm3 = vcmp.eq.s32.totalorder %v66_v38, %v2339_v44  ;;  %v1954_v49 = vsel %vm92_vm0, 1.0, %v2199_v48  ;;  %v1955_v50 = vsel %vm93_vm1, 1.0, %v2199_v48 }
  0xab   :  { %v1950_v51 = vsel %vm70_vm2, 1.0, %v2199_v48  ;;  %v1951_v52 = vsel %vm71_vm3, 1.0, %v2199_v48 }
  0xac   :  { %v91_v37 = vpop.permute.xlu1 %90  ;;  %v104_v60 = vadd.f32 %v1954_v49, %v1950_v51  ;;  %v105_v61 = vadd.f32 %v1955_v50, %v1951_v52 }
  0xad   :  { %v69_v42 = vpop.permute.xlu0 %68  ;;  %vm94_vm4 = vcmp.eq.s32.totalorder %v91_v37, %v2336_v41  ;;  %vm95_vm5 = vcmp.eq.s32.totalorder %v91_v37, %v2339_v44 }
  0xae   :  { %vm72_vm6 = vcmp.eq.s32.totalorder %v69_v42, %v2336_v41  ;;  %vm73_vm7 = vcmp.eq.s32.totalorder %v69_v42, %v2339_v44  ;;  %v1956_v53 = vsel %vm94_vm4, 1.0, %v2199_v48  ;;  %v1957_v54 = vsel %vm95_vm5, 1.0, %v2199_v48 }
  0xaf   :  { %v1952_v55 = vsel %vm72_vm6, 1.0, %v2199_v48  ;;  %v1953_v56 = vsel %vm73_vm7, 1.0, %v2199_v48 }
  0xb0   :  { %v106_v62 = vadd.f32 %v1956_v53, %v1952_v55  ;;  %v107_v63 = vadd.f32 %v1957_v54, %v1953_v56  ;;  %v415_v55 = vld [vmem:[#allocation2 + $0x20] sm:$0xff] }
  0xb1   :  { %v113_v40 = vpop.permute.xlu1 %112 }
  0xb2   :  { %v110_v45 = vpop.permute.xlu0 %109  ;;  %vm116_vm10 = vcmp.eq.s32.totalorder %v113_v40, %v2336_v41  ;;  %vm117_vm11 = vcmp.eq.s32.totalorder %v113_v40, %v2339_v44 }
  0xb3   :  { %vm114_vm8 = vcmp.eq.s32.totalorder %v110_v45, %v2336_v41  ;;  %vm115_vm9 = vcmp.eq.s32.totalorder %v110_v45, %v2339_v44  ;;  %v1960_v2 = vsel %vm116_vm10, 1.0, %v2199_v48  ;;  %v1961_v3 = vsel %vm117_vm11, 1.0, %v2199_v48 }
  0xb4   :  { %v1958_v58 = vsel %vm114_vm8, 1.0, %v2199_v48  ;;  %v1959_v59 = vsel %vm115_vm9, 1.0, %v2199_v48  ;;  %v128_v11 = vadd.f32 %v1960_v2, %v106_v62  ;;  %v129_v12 = vadd.f32 %v1961_v3, %v107_v63  ;;  %v431_v2 = vld [vmem:[#allocation2 + $0xa0] sm:$0xff] }
  0xb5   :  { %v126_v4 = vadd.f32 %v1958_v58, %v104_v60  ;;  %v127_v5 = vadd.f32 %v1959_v59, %v105_v61  ;;  %v447_v62 = vunpack.c.l.s8.bf16 %v415_v55  ;;  %v464_v63 = vunpack.c.h.s8.bf16 %v2329_v27 }
  0xb6   :  { %v132_v43 = vpop.permute.xlu1 %131 }
  0xb7   :  { %v135_v57 = vpop.permute.xlu0 %134  ;;  %vm136_vm12 = vcmp.eq.s32.totalorder %v132_v43, %v2336_v41  ;;  %vm137_vm13 = vcmp.eq.s32.totalorder %v132_v43, %v2339_v44 }
  0xb8   :  { %vm138_vm14 = vcmp.eq.s32.totalorder %v135_v57, %v2336_v41  ;;  %vm139_vm15 = vcmp.eq.s32.totalorder %v135_v57, %v2339_v44  ;;  %v1962_v7 = vsel %vm136_vm12, 1.0, %v2199_v48  ;;  %v1963_v8 = vsel %vm137_vm13, 1.0, %v2199_v48 }
  0xb9   :  { %v1964_v9 = vsel %vm138_vm14, 1.0, %v2199_v48  ;;  %v1965_v10 = vsel %vm139_vm15, 1.0, %v2199_v48  ;;  %v148_v13 = vadd.f32 %v1962_v7, %v126_v4  ;;  %v149_v14 = vadd.f32 %v1963_v8, %v127_v5  ;;  %v414_v8 = vld [vmem:[#allocation2 + $0x18] sm:$0xff] }
  0xba   :  { %v150_v19 = vadd.f32 %v1964_v9, %v128_v11  ;;  %v151_v20 = vadd.f32 %v1965_v10, %v129_v12  ;;  %v479_v4 = vunpack.c.l.s8.bf16 %v431_v2  ;;  %v492_v5 = vunpack.c.h.s8.bf16 %v2332_v34  ;;  %v420_v9 = vld [vmem:[#allocation2 + $0x48] sm:$0xff] }
  0xbb   :  { %v154_v46 = vpop.permute.xlu1 %153  ;;  %v495_v7 = vunpack.c.h.s8.bf16 %v431_v2  ;;  %v446_v10 = vunpack.c.l.s8.bf16 %v414_v8  ;;  %v452_v11 = vunpack.c.l.s8.bf16 %v420_v9 }
  0xbc   :  { %v176_v6 = vpop.permute.xlu0 %175  ;;  %vm158_vm2 = vcmp.eq.s32.totalorder %v154_v46, %v2336_v41  ;;  %vm159_vm3 = vcmp.eq.s32.totalorder %v154_v46, %v2339_v44 }
  0xbd   :  { %v1966_v21 = vsel %vm158_vm2, 1.0, %v2199_v48  ;;  %v1967_v22 = vsel %vm159_vm3, 1.0, %v2199_v48  ;;  %vm180_vm6 = vcmp.eq.s32.totalorder %v176_v6, %v2336_v41  ;;  %vm181_vm7 = vcmp.eq.s32.totalorder %v176_v6, %v2339_v44 }
  0xbe   :  { %v170_v28 = vadd.f32 %v1966_v21, %v148_v13  ;;  %v171_v29 = vadd.f32 %v1967_v22, %v149_v14  ;;  %v1970_v30 = vsel %vm180_vm6, 1.0, %v2199_v48  ;;  %v1971_v31 = vsel %vm181_vm7, 1.0, %v2199_v48 }
  0xbf   :  { %v157_v47 = vpop.permute.xlu1 %156  ;;  %v462_v22 = vunpack.c.h.s8.bf16 %v414_v8 }
  0xc0   :  { %vm160_vm0 = vcmp.eq.s32.totalorder %v157_v47, %v2336_v41  ;;  %vm161_vm1 = vcmp.eq.s32.totalorder %v157_v47, %v2339_v44  ;;  %v192_v42 = vadd.f32 %v1970_v30, %v170_v28  ;;  %v193_v43 = vadd.f32 %v1971_v31, %v171_v29  ;;  %v429_v31 = vld [vmem:[#allocation2 + $0x90] sm:$0xff] }
  0xc1   :  { %v1968_v15 = vsel %vm160_vm0, 1.0, %v2199_v48  ;;  %v1969_v16 = vsel %vm161_vm1, 1.0, %v2199_v48  ;;  %v201_v17 = vpop.permute.xlu0 %200  ;;  %vm508_vm0 = vcmask 523264  }
  0xc2   :  { %v172_v25 = vadd.f32 %v1968_v15, %v150_v19  ;;  %v173_v26 = vadd.f32 %v1969_v16, %v151_v20  ;;  %vm204_vm8 = vcmp.eq.s32.totalorder %v201_v17, %v2336_v41  ;;  %vm205_vm9 = vcmp.eq.s32.totalorder %v201_v17, %v2339_v44  ;;  %v413_v16 = vld [vmem:[#allocation2 + $0x10] sm:$0xff]  ;;  %v419_v17 = vld [vmem:[#allocation2 + $0x40] sm:$0xff] }
  0xc3   :  { %v1976_v36 = vsel %vm204_vm8, 1.0, %v2199_v48  ;;  %v1977_v37 = vsel %vm205_vm9, 1.0, %v2199_v48  ;;  %v445_v19 = vunpack.c.l.s8.bf16 %v413_v16  ;;  %v451_v20 = vunpack.c.l.s8.bf16 %v419_v17 }
  0xc4   :  { %v179_v0 = vpop.permute.xlu1 %178  ;;  %v467_v28 = vunpack.c.h.s8.bf16 %v419_v17 }
  0xc5   :  { %vm182_vm4 = vcmp.eq.s32.totalorder %v179_v0, %v2336_v41  ;;  %vm183_vm5 = vcmp.eq.s32.totalorder %v179_v0, %v2339_v44  ;;  %v432_v0 = vld [vmem:[#allocation2 + $0xa8] sm:$0xff] }
  0xc6   :  { %v1972_v23 = vsel %vm182_vm4, 1.0, %v2199_v48  ;;  %v1973_v24 = vsel %vm183_vm5, 1.0, %v2199_v48  ;;  %v496_v27 = vunpack.c.h.s8.bf16 %v432_v0 }
  0xc7   :  { %v194_v32 = vadd.f32 %v1972_v23, %v172_v25  ;;  %v195_v33 = vadd.f32 %v1973_v24, %v173_v26  ;;  %v468_v23 = vunpack.c.h.s8.bf16 %v420_v9  ;;  %v430_v24 = vld [vmem:[#allocation2 + $0x98] sm:$0xff]  ;;  %v436_v25 = vld [vmem:[#allocation2 + $0xc8] sm:$0xff]  ;;  %v461_v26 = vunpack.c.h.s8.bf16 %v413_v16 }
  0xc8   :  { %v478_v29 = vunpack.c.l.s8.bf16 %v430_v24  ;;  %v484_v30 = vunpack.c.l.s8.bf16 %v436_v25 }
  0xc9   :  { %v198_v18 = vpop.permute.xlu1 %197  ;;  %v216_v45 = vadd.f32 %v1976_v36, %v194_v32  ;;  %v217_v46 = vadd.f32 %v1977_v37, %v195_v33  ;;  %v435_v32 = vld [vmem:[#allocation2 + $0xc0] sm:$0xff]  ;;  %v477_v33 = vunpack.c.l.s8.bf16 %v429_v31  ;;  %v494_v36 = vunpack.c.h.s8.bf16 %v430_v24  ;;  %v1189_v24 = vld [vmem:[#allocation5 + $0x228] sm:$0xff] }
  0xca   :  { %vm202_vm10 = vcmp.eq.s32.totalorder %v198_v18, %v2336_v41  ;;  %vm203_vm11 = vcmp.eq.s32.totalorder %v198_v18, %v2339_v44  ;;  %v500_v37 = vunpack.c.h.s8.bf16 %v436_v25 }
  0xcb   :  { %v1974_v38 = vsel %vm202_vm10, 1.0, %v2199_v48  ;;  %v1975_v40 = vsel %vm203_vm11, 1.0, %v2199_v48 }
  0xcc   :  { %v214_v51 = vadd.f32 %v1974_v38, %v192_v42  ;;  %v215_v52 = vadd.f32 %v1975_v40, %v193_v43  ;;  %v418_v38 = vld [vmem:[#allocation2 + $0x38] sm:$0xff]  ;;  %v424_v40 = vld [vmem:[#allocation2 + $0x68] sm:$0xff]  ;;  %v493_v42 = vunpack.c.h.s8.bf16 %v429_v31  ;;  %v499_v43 = vunpack.c.h.s8.bf16 %v435_v32  ;;  %v1188_v31 = vld [vmem:[#allocation5 + $0x220] sm:$0xff] }
  0xce   :  { %v220_v35 = vpop.permute.xlu1 %219 }
  0xcf   :  { %vm224_vm12 = vcmp.eq.s32.totalorder %v220_v35, %v2336_v41  ;;  %vm225_vm13 = vcmp.eq.s32.totalorder %v220_v35, %v2339_v44  ;;  %v483_v35 = vunpack.c.l.s8.bf16 %v435_v32 }
  0xd0   :  { %v1978_v47 = vsel %vm224_vm12, 1.0, %v2199_v48  ;;  %v1979_v49 = vsel %vm225_vm13, 1.0, %v2199_v48 }
  0xd1   :  { %v236_v56 = vadd.f32 %v1978_v47, %v214_v51  ;;  %v237_v58 = vadd.f32 %v1979_v49, %v215_v52  ;;  %v417_v47 = vld [vmem:[#allocation2 + $0x30] sm:$0xff]  ;;  %v423_v49 = vld [vmem:[#allocation2 + $0x60] sm:$0xff]  ;;  %v466_v52 = vunpack.c.h.s8.bf16 %v418_v38 }
  0xd2   :  { %v223_v50 = vpop.permute.xlu1 %222  ;;  %v455_v51 = vunpack.c.l.s8.bf16 %v423_v49 }
  0xd3   :  { %vm226_vm14 = vcmp.eq.s32.totalorder %v223_v50, %v2336_v41  ;;  %vm227_vm15 = vcmp.eq.s32.totalorder %v223_v50, %v2339_v44  ;;  %v463_v41 = vunpack.c.h.s8.bf16 %v415_v55  ;;  %v480_v44 = vunpack.c.l.s8.bf16 %v432_v0  ;;  %v440_v55 = vld [vmem:[#allocation2 + $0xe8] sm:$0xff] }
  0xd4   :  { %v1980_v53 = vsel %vm226_vm14, 1.0, %v2199_v48  ;;  %v1981_v54 = vsel %vm227_vm15, 1.0, %v2199_v48  ;;  %v427_v48 = vld [vmem:[#allocation2 + $0x80] sm:$0xff]  ;;  %v449_v50 = vunpack.c.l.s8.bf16 %v417_v47 }
  0xd5   :  { %v238_v57 = vadd.f32 %v1980_v53, %v216_v45  ;;  %v239_v59 = vadd.f32 %v1981_v54, %v217_v46  ;;  %v475_v3 = vunpack.c.l.s8.bf16 %v427_v48  ;;  %v491_v6 = vunpack.c.h.s8.bf16 %v427_v48  ;;  %v434_v54 = vld [vmem:[#allocation2 + $0xb8] sm:$0xff]  ;;  %v1185_v48 = vld [vmem:[#allocation5 + $0x208] sm:$0xff] }
  0xd6   :  { %v450_v45 = vunpack.c.l.s8.bf16 %v418_v38  ;;  %v456_v46 = vunpack.c.l.s8.bf16 %v424_v40  ;;  %v472_v53 = vunpack.c.h.s8.bf16 %v424_v40  ;;  %v498_v0 = vunpack.c.h.s8.bf16 %v434_v54  ;;  %v1191_v38 = vld [vmem:[#allocation5 + $0x238] sm:$0xff] }
  0xd7   :  { %v241_v60 = vpack.c.bf16 %v239_v59, %v237_v58  ;;  %v240_v61 = vpack.c.bf16 %v238_v57, %v236_v56  ;;  %517 = vmatpush1.bf16.msra.mxu1 %v475_v3  ;;  %v465_v56 = vunpack.c.h.s8.bf16 %v417_v47  ;;  %v471_v57 = vunpack.c.h.s8.bf16 %v423_v49  ;;  %v1190_v47 = vld [vmem:[#allocation5 + $0x230] sm:$0xff] }
  0xd8   :  { %518 = vmatprep.subr.bf16.mxu1 %v492_v5  ;;  %v482_v58 = vunpack.c.l.s8.bf16 %v434_v54  ;;  %v488_v59 = vunpack.c.l.s8.bf16 %v440_v55  ;;  %v421_v5 = vld [vmem:[#allocation2 + $0x50] sm:$0xff]  ;;  %v1193_v54 = vld [vmem:[#allocation5 + $0x248] sm:$0xff] }
  0xd9   :  { %402 = vmatprep.mubr.bf16.mxu0 %v241_v60  ;;  %v433_v60 = vld [vmem:[#allocation2 + $0xb0] sm:$0xff] }
  0xda   :  { %403 = vmatmul.mubr.bf16.vlgmr.msra.gmra.mrb[0].mxu0 %v240_v61  ;;  %v439_v61 = vld [vmem:[#allocation2 + $0xe0] sm:$0xff]  ;;  %v497_v2 = vunpack.c.h.s8.bf16 %v433_v60 }
  0xdb   :  { %599 = vmatpush1.bf16.msra.mxu0 %v447_v62  ;;  %630 = vmatprep.mubr.bf16.mxu0 %v2192_v1  ;;  %v481_v62 = vunpack.c.l.s8.bf16 %v433_v60  ;;  %v503_v3 = vunpack.c.h.s8.bf16 %v439_v61 }
  0xdc   :  { %600 = vmatprep.subr.bf16.mxu0 %v464_v63  ;;  %519 = vmatpush1.bf16.msra.mxu1 %v491_v6  ;;  %v487_v63 = vunpack.c.l.s8.bf16 %v439_v61  ;;  %v1184_v6 = vld [vmem:[#allocation5 + $0x200] sm:$0xff] }
  0xdd   :  { %555 = vmatprep.subr.bf16.mxu1 %v446_v10  ;;  %v1376_v9 = vunpack.c.l.s8.bf16 %v1184_v6  ;;  %v438_v10 = vld [vmem:[#allocation2 + $0xd8] sm:$0xff]  ;;  %v1378_v16 = vunpack.c.h.s8.bf16 %v1184_v6  ;;  %v1124_v6 = vld [vmem:[#allocation5 + $0x20] sm:$0xff] }
  0xdf   :  { %601 = vmatpush1.bf16.msra.mxu0 %v463_v41  ;;  %v504_v41 = vunpack.c.h.s8.bf16 %v440_v55 }
  0xe0   :  { %602 = vmatprep.subr.bf16.mxu0 %v480_v44  ;;  %v422_v44 = vld [vmem:[#allocation2 + $0x58] sm:$0xff] }
  0xe1   :  { %v470_v8 = vunpack.c.h.s8.bf16 %v422_v44 }
  0xe3   :  { %603 = vmatpush1.bf16.msra.mxu0 %v479_v4  ;;  %v454_v4 = vunpack.c.l.s8.bf16 %v422_v44 }
  0xe4   :  { %604 = vmatprep.subr.bf16.mxu0 %v496_v27  ;;  %v1377_v27 = vunpack.c.l.s8.bf16 %v1185_v48 }
  0xe7   :  { %605 = vmatpush1.bf16.msra.mxu0 %v495_v7  ;;  %v453_v7 = vunpack.c.l.s8.bf16 %v421_v5 }
  0xe8   :  { %684 = vmatprep.subr.bf16.mxu0 %v452_v11  ;;  %v1379_v11 = vunpack.c.h.s8.bf16 %v1185_v48  ;;  %v1122_v48 = vld [vmem:[#allocation5 + $0x10] sm:$0xff] }
 0x1ad   :  { %v2022_v12 = vpop.f32.mrb[0].mxu0 }
 0x1ae   :  { %v2023_v13 = vpop.f32.mrb[1].mxu0 }
 0x1af   :  { %v2024_v14 = vadd.f32 %v2023_v13, %v2022_v12  ;;  %v2025_v15 = vpop.f32.mrb[2].mxu0  ;;  %v1187_v12 = vld [vmem:[#allocation5 + $0x218] sm:$0xff]  ;;  %v469_v13 = vunpack.c.h.s8.bf16 %v421_v5  ;;  %v1254_v5 = vunpack.c.h.s8.bf16 %v1122_v48 }
 0x1b0   :  { %v2026_v34 = vpop.f32.mrb[3].mxu0  ;;  %v1381_v17 = vunpack.c.l.s8.bf16 %v1187_v12 }
 0x1b1   :  { %v2027_v18 = vadd.f32 %v2026_v34, %v2025_v15  ;;  %v437_v15 = vld [vmem:[#allocation2 + $0xd0] sm:$0xff] }
 0x1b2   :  { %v1186_v34 = vld [vmem:[#allocation5 + $0x210] sm:$0xff]  ;;  %v501_v25 = vunpack.c.h.s8.bf16 %v437_v15 }
 0x1b3   :  { %v2408_v21 = vpack.c.bf16 %v2027_v18, %v2024_v14  ;;  %v486_v14 = vunpack.c.l.s8.bf16 %v438_v10  ;;  %v485_v18 = vunpack.c.l.s8.bf16 %v437_v15 }
 0x1b5   :  { %1998 = vmatmul.mubr.msk.bf16.vlgmr.msra.gmra.mrb[0].mxu1 %vm508_vm0, %v2408_v21  ;;  %2000 = vmatmul.mubr.msk.bf16.vlgmr.msra.gmra.mrb[4].mxu0 %vm508_vm0, %v2408_v21 }
 0x1b6   :  { %556 = vmatpush1.bf16.msra.mxu1 %v445_v19  ;;  %685 = vmatpush1.bf16.msra.mxu0 %v451_v20  ;;  %v502_v19 = vunpack.c.h.s8.bf16 %v438_v10  ;;  %v1380_v20 = vunpack.c.l.s8.bf16 %v1186_v34  ;;  %v1258_v10 = vunpack.c.h.s8.bf16 %v1124_v6 }
 0x1b7   :  { %557 = vmatprep.subr.bf16.mxu1 %v462_v22  ;;  %686 = vmatprep.subr.bf16.mxu0 %v468_v23  ;;  %v426_v22 = vld [vmem:[#allocation2 + $0x78] sm:$0xff]  ;;  %v1383_v23 = vunpack.c.h.s8.bf16 %v1187_v12 }
 0x1b8   :  { %587 = vmatprep.mubr.bf16.mxu1 %v2192_v1  ;;  %716 = vmatprep.mubr.bf16.mxu0 %v2192_v1 }
 0x1ba   :  { %558 = vmatpush1.bf16.msra.mxu1 %v461_v26  ;;  %687 = vmatpush1.bf16.msra.mxu0 %v467_v28  ;;  %v458_v26 = vunpack.c.l.s8.bf16 %v426_v22  ;;  %v425_v28 = vld [vmem:[#allocation2 + $0x70] sm:$0xff] }
 0x1bb   :  { %559 = vmatprep.subr.bf16.mxu1 %v478_v29  ;;  %688 = vmatprep.subr.bf16.mxu0 %v484_v30  ;;  %v1382_v29 = vunpack.c.h.s8.bf16 %v1186_v34  ;;  %v1385_v30 = vunpack.c.l.s8.bf16 %v1189_v24  ;;  %v457_v32 = vunpack.c.l.s8.bf16 %v425_v28  ;;  %v473_v40 = vunpack.c.h.s8.bf16 %v425_v28  ;;  %v1129_v28 = vld [vmem:[#allocation5 + $0x48] sm:$0xff] }
 0x1be   :  { %560 = vmatpush1.bf16.msra.mxu1 %v477_v33  ;;  %689 = vmatpush1.bf16.msra.mxu0 %v483_v35  ;;  %v474_v33 = vunpack.c.h.s8.bf16 %v426_v22  ;;  %v1384_v35 = vunpack.c.l.s8.bf16 %v1188_v31 }
 0x1bf   :  { %561 = vmatprep.subr.bf16.mxu1 %v494_v36  ;;  %690 = vmatprep.subr.bf16.mxu0 %v500_v37  ;;  %v442_v36 = vld [vmem:[#allocation2 + $0xf8] sm:$0xff]  ;;  %v1387_v37 = vunpack.c.h.s8.bf16 %v1189_v24 }
 0x1c2   :  { %562 = vmatpush1.bf16.msra.mxu1 %v493_v42  ;;  %691 = vmatpush1.bf16.msra.mxu0 %v499_v43  ;;  %v490_v42 = vunpack.c.l.s8.bf16 %v442_v36  ;;  %v441_v43 = vld [vmem:[#allocation2 + $0xf0] sm:$0xff] }
 0x1c3   :  { %641 = vmatprep.subr.bf16.mxu1 %v450_v45  ;;  %770 = vmatprep.subr.bf16.mxu0 %v456_v46  ;;  %v1386_v45 = vunpack.c.h.s8.bf16 %v1188_v31  ;;  %v1389_v46 = vunpack.c.l.s8.bf16 %v1191_v38  ;;  %v489_v49 = vunpack.c.l.s8.bf16 %v441_v43  ;;  %v1265_v31 = vunpack.c.l.s8.bf16 %v1129_v28 }
 0x1c5   :  { %1999 = vmatmul.mubr.msk.bf16.vlgmr.msra.gmra.mrb[4].mxu1 %vm508_vm0, %v2408_v21  ;;  %2002 = vmatmul.mubr.msk.bf16.vlgmr.msra.gmra.mrb[8].mxu0 %vm508_vm0, %v2408_v21 }
 0x1c6   :  { %642 = vmatpush1.bf16.msra.mxu1 %v449_v50  ;;  %771 = vmatpush1.bf16.msra.mxu0 %v455_v51  ;;  %v506_v50 = vunpack.c.h.s8.bf16 %v442_v36  ;;  %v1388_v51 = vunpack.c.l.s8.bf16 %v1190_v47 }
 0x1c7   :  { %643 = vmatprep.subr.bf16.mxu1 %v466_v52  ;;  %772 = vmatprep.subr.bf16.mxu0 %v472_v53  ;;  %v1121_v52 = vld [vmem:[#allocation5 + $0x8] sm:$0xff]  ;;  %v1391_v53 = vunpack.c.h.s8.bf16 %v1191_v38  ;;  %v1196_v38 = vld [vmem:[#allocation5 + $0x260] sm:$0xff] }
 0x1c8   :  { %673 = vmatprep.mubr.bf16.mxu1 %v2192_v1  ;;  %802 = vmatprep.mubr.bf16.mxu0 %v2192_v1  ;;  %v1249_v55 = vunpack.c.l.s8.bf16 %v1121_v52  ;;  %v1251_v61 = vunpack.c.h.s8.bf16 %v1121_v52  ;;  %v1402_v52 = vunpack.c.h.s8.bf16 %v1196_v38 }
 0x1ca   :  { %644 = vmatpush1.bf16.msra.mxu1 %v465_v56  ;;  %773 = vmatpush1.bf16.msra.mxu0 %v471_v57  ;;  %v1120_v56 = vld [vmem:[#allocation5] sm:$0xff]  ;;  %v1390_v57 = vunpack.c.h.s8.bf16 %v1190_v47 }
 0x1cb   :  { %645 = vmatprep.subr.bf16.mxu1 %v482_v58  ;;  %774 = vmatprep.subr.bf16.mxu0 %v488_v59  ;;  %v1393_v58 = vunpack.c.l.s8.bf16 %v1193_v54  ;;  %v1192_v59 = vld [vmem:[#allocation5 + $0x240] sm:$0xff]  ;;  %v1248_v60 = vunpack.c.l.s8.bf16 %v1120_v56 }
 0x1cc   :  { %v1394_v15 = vunpack.c.h.s8.bf16 %v1192_v59 }
 0x1ce   :  { %646 = vmatpush1.bf16.msra.mxu1 %v481_v62  ;;  %775 = vmatpush1.bf16.msra.mxu0 %v487_v63  ;;  %v1392_v62 = vunpack.c.l.s8.bf16 %v1192_v59  ;;  %v1123_v63 = vld [vmem:[#allocation5 + $0x18] sm:$0xff]  ;;  %v1133_v59 = vld [vmem:[#allocation5 + $0x68] sm:$0xff] }
 0x1cf   :  { %647 = vmatprep.subr.bf16.mxu1 %v498_v0  ;;  %776 = vmatprep.subr.bf16.mxu0 %v504_v41  ;;  %v1395_v0 = vunpack.c.h.s8.bf16 %v1193_v54  ;;  %v1250_v41 = vunpack.c.h.s8.bf16 %v1120_v56  ;;  %v1253_v44 = vunpack.c.l.s8.bf16 %v1123_v63  ;;  %v1199_v54 = vld [vmem:[#allocation5 + $0x278] sm:$0xff]  ;;  %v1198_v56 = vld [vmem:[#allocation5 + $0x270] sm:$0xff] }
 0x1d2   :  { %648 = vmatpush1.bf16.msra.mxu1 %v497_v2  ;;  %777 = vmatpush1.bf16.msra.mxu0 %v503_v3  ;;  %v1252_v2 = vunpack.c.l.s8.bf16 %v1122_v48  ;;  %v1255_v3 = vunpack.c.h.s8.bf16 %v1123_v63  ;;  %v1132_v63 = vld [vmem:[#allocation5 + $0x60] sm:$0xff] }
 0x1d3   :  { %727 = vmatprep.subr.bf16.mxu1 %v454_v4  ;;  %1692 = vmatprep.subr.bf16.mxu0 %v1377_v27  ;;  %v1125_v4 = vld [vmem:[#allocation5 + $0x28] sm:$0xff] }
 0x1d4   :  { %v1257_v27 = vunpack.c.l.s8.bf16 %v1125_v4 }
 0x1d5   :  { %2001 = vmatmul.mubr.msk.bf16.vlgmr.msra.gmra.mrb[8].mxu1 %vm508_vm0, %v2408_v21  ;;  %2004 = vmatmul.mubr.msk.bf16.vlgmr.msra.gmra.mrb[12].mxu0 %vm508_vm0, %v2408_v21 }
 0x1d6   :  { %728 = vmatpush1.bf16.msra.mxu1 %v453_v7  ;;  %759 = vmatprep.mubr.bf16.mxu1 %v2192_v1  ;;  %v1256_v7 = vunpack.c.l.s8.bf16 %v1124_v6  ;;  %v1134_v6 = vld [vmem:[#allocation5 + $0x70] sm:$0xff] }
 0x1d7   :  { %729 = vmatprep.subr.bf16.mxu1 %v470_v8  ;;  %1693 = vmatpush1.bf16.msra.mxu0 %v1376_v9  ;;  %v1127_v8 = vld [vmem:[#allocation5 + $0x38] sm:$0xff]  ;;  %v2433_v9 = vshrl.u32 %v61_v39, 7 }
 0x1d8   :  { %1694 = vmatprep.subr.bf16.mxu0 %v1379_v11  ;;  %v1261_v12 = vunpack.c.l.s8.bf16 %v1127_v8  ;;  %v1263_v24 = vunpack.c.h.s8.bf16 %v1127_v8 }
 0x1d9   :  { %v2436_v11 = vsub.s32 4, %v2433_v9 }
 0x1da   :  { %730 = vmatpush1.bf16.msra.mxu1 %v469_v13  ;;  %v1126_v13 = vld [vmem:[#allocation5 + $0x30] sm:$0xff] }
 0x1db   :  { %731 = vmatprep.subr.bf16.mxu1 %v486_v14  ;;  %1695 = vmatpush1.bf16.msra.mxu0 %v1378_v16  ;;  %v2441_v14 = vld [vmem:[%s2677_s3] sm:$0xff]  ;;  %v2444_v16 = vsub.s32 5, %v2433_v9 }
 0x1dc   :  { %1696 = vmatprep.subr.bf16.mxu0 %v1381_v17  ;;  %v2448_v39 = vrot.slane %v2441_v14, %v2436_v11  ;;  %v2453_v17 = vld [vmem:[%s2678_s4] sm:$0xff] }
 0x1dd   :  { %v2457_v34 = vrot.slane %v2441_v14, %v2444_v16 }
 0x1de   :  { %732 = vmatpush1.bf16.msra.mxu1 %v485_v18  ;;  %v1195_v18 = vld [vmem:[#allocation5 + $0x258] sm:$0xff] }
 0x1df   :  { %733 = vmatprep.subr.bf16.mxu1 %v502_v19  ;;  %1697 = vmatpush1.bf16.msra.mxu0 %v1380_v20  ;;  %v1260_v19 = vunpack.c.l.s8.bf16 %v1126_v13  ;;  %v2461_v20 = vrot.slane %v2453_v17, %v2436_v11  ;;  %v1397_v22 = vunpack.c.l.s8.bf16 %v1195_v18 }
 0x1e0   :  { %1698 = vmatprep.subr.bf16.mxu0 %v1383_v23  ;;  %v1194_v23 = vld [vmem:[#allocation5 + $0x250] sm:$0xff] }
 0x1e2   :  { %734 = vmatpush1.bf16.msra.mxu1 %v501_v25  ;;  %v2465_v25 = vrot.slane %v2453_v17, %v2444_v16 }
 0x1e3   :  { %813 = vmatprep.subr.bf16.mxu1 %v458_v26  ;;  %1699 = vmatpush1.bf16.msra.mxu0 %v1382_v29  ;;  %v1396_v26 = vunpack.c.l.s8.bf16 %v1194_v23  ;;  %v1262_v29 = vunpack.c.h.s8.bf16 %v1126_v13 }
 0x1e4   :  { %1700 = vmatprep.subr.bf16.mxu0 %v1385_v30  ;;  %v1399_v30 = vunpack.c.h.s8.bf16 %v1195_v18 }
 0x1e5   :  { %2003 = vmatmul.mubr.msk.bf16.vlgmr.msra.gmra.mrb[12].mxu1 %vm508_vm0, %v2408_v21 }
 0x1e6   :  { %814 = vmatpush1.bf16.msra.mxu1 %v457_v32  ;;  %845 = vmatprep.mubr.bf16.mxu1 %v2192_v1  ;;  %v505_v1 = vunpack.c.h.s8.bf16 %v441_v43  ;;  %v1128_v32 = vld [vmem:[#allocation5 + $0x40] sm:$0xff]  ;;  %v1131_v43 = vld [vmem:[#allocation5 + $0x58] sm:$0xff] }
 0x1e7   :  { %815 = vmatprep.subr.bf16.mxu1 %v474_v33  ;;  %1701 = vmatpush1.bf16.msra.mxu0 %v1384_v35  ;;  %v1398_v33 = vunpack.c.h.s8.bf16 %v1194_v23  ;;  %v1197_v35 = vld [vmem:[#allocation5 + $0x268] sm:$0xff]  ;;  %v1264_v36 = vunpack.c.l.s8.bf16 %v1128_v32 }
 0x1e8   :  { %1702 = vmatprep.subr.bf16.mxu0 %v1387_v37  ;;  %v1401_v37 = vunpack.c.l.s8.bf16 %v1197_v35  ;;  %v1403_v47 = vunpack.c.h.s8.bf16 %v1197_v35 }
 0x1ea   :  { %816 = vmatpush1.bf16.msra.mxu1 %v473_v40  ;;  %v1267_v40 = vunpack.c.h.s8.bf16 %v1129_v28  ;;  %v2521_v28 = vld [vmem:[#allocation5 + $0x88] sm:$0xff] }
 0x1eb   :  { %817 = vmatprep.subr.bf16.mxu1 %v490_v42  ;;  %1703 = vmatpush1.bf16.msra.mxu0 %v1386_v45  ;;  %v1400_v42 = vunpack.c.l.s8.bf16 %v1196_v38  ;;  %v2468_v45 = vsub.s32 2, %v2433_v9 }
 0x1ec   :  { %1704 = vmatprep.subr.bf16.mxu0 %v1389_v46  ;;  %v1266_v46 = vunpack.c.h.s8.bf16 %v1128_v32 }
 0x1ee   :  { %818 = vmatpush1.bf16.msra.mxu1 %v489_v49  ;;  %v1269_v49 = vunpack.c.l.s8.bf16 %v1131_v43 }
 0x1ef   :  { %819 = vmatprep.subr.bf16.mxu1 %v506_v50  ;;  %1705 = vmatpush1.bf16.msra.mxu0 %v1388_v51  ;;  %v1130_v50 = vld [vmem:[#allocation5 + $0x50] sm:$0xff]  ;;  %v2472_v51 = vrot.slane %v2441_v14, %v2468_v45 }
 0x1f0   :  { %1706 = vmatprep.subr.bf16.mxu0 %v1391_v53  ;;  %v2476_v53 = vrot.slane %v2453_v17, %v2468_v45 }
 0x1f2   :  { %820 = vmatpush1.bf16.msra.mxu1 %v505_v1  ;;  %v1268_v1 = vunpack.c.l.s8.bf16 %v1130_v50 }
 0x1f3   :  { %1520 = vmatprep.subr.bf16.mxu1 %v1249_v55  ;;  %1707 = vmatpush1.bf16.msra.mxu0 %v1390_v57  ;;  %v1405_v55 = vunpack.c.l.s8.bf16 %v1199_v54  ;;  %v1271_v57 = vunpack.c.h.s8.bf16 %v1131_v43 }
 0x1f4   :  { %1708 = vmatprep.subr.bf16.mxu0 %v1393_v58  ;;  %v1404_v58 = vunpack.c.l.s8.bf16 %v1198_v56 }
 0x1f5   :  { %2005 = vmatmul.mubr.msk.bf16.vlgmr.msra.gmra.mrb[16].mxu1 %vm508_vm0, %v2408_v21  ;;  %v1259_v21 = vunpack.c.h.s8.bf16 %v1125_v4  ;;  %v1274_v4 = vunpack.c.h.s8.bf16 %v1132_v63 }
 0x1f6   :  { %1521 = vmatpush1.bf16.msra.mxu1 %v1248_v60  ;;  %v1270_v60 = vunpack.c.h.s8.bf16 %v1130_v50 }
 0x1f7   :  { %1522 = vmatprep.subr.bf16.mxu1 %v1251_v61  ;;  %1709 = vmatpush1.bf16.msra.mxu0 %v1392_v62  ;;  %v1407_v61 = vunpack.c.h.s8.bf16 %v1199_v54  ;;  %v1273_v62 = vunpack.c.l.s8.bf16 %v1133_v59 }
 0x1f8   :  { %1710 = vmatprep.subr.bf16.mxu0 %v1395_v0  ;;  %v1406_v0 = vunpack.c.h.s8.bf16 %v1198_v56 }
 0x1fa   :  { %1523 = vmatpush1.bf16.msra.mxu1 %v1250_v41  ;;  %v2478_v41 = vld [vmem:[#allocation5 + $0x288] sm:$0xff] }
 0x1fb   :  { %1524 = vmatprep.subr.bf16.mxu1 %v1253_v44  ;;  %1711 = vmatpush1.bf16.msra.mxu0 %v1394_v15  ;;  %v1272_v44 = vunpack.c.l.s8.bf16 %v1132_v63  ;;  %v1409_v48 = vunpack.c.l.s8.bf16 %v2478_v41 }
 0x1fc   :  { %1712 = vmatprep.subr.bf16.mxu0 %v1397_v22 }
 0x1fe   :  { %1525 = vmatpush1.bf16.msra.mxu1 %v1252_v2  ;;  %v1275_v2 = vunpack.c.h.s8.bf16 %v1133_v59 }
 0x1ff   :  { %1526 = vmatprep.subr.bf16.mxu1 %v1255_v3  ;;  %1713 = vmatpush1.bf16.msra.mxu0 %v1396_v26  ;;  %v1135_v3 = vld [vmem:[#allocation5 + $0x78] sm:$0xff] }
 0x200   :  { %1714 = vmatprep.subr.bf16.mxu0 %v1399_v30  ;;  %v1279_v23 = vunpack.c.h.s8.bf16 %v1135_v3  ;;  %v1281_v30 = vunpack.c.l.s8.bf16 %v2521_v28 }
 0x202   :  { %1527 = vmatpush1.bf16.msra.mxu1 %v1254_v5  ;;  %v886_v5 = vsub.s32 6, %v2433_v9 }
 0x203   :  { %1528 = vmatprep.subr.bf16.mxu1 %v1257_v27  ;;  %1715 = vmatpush1.bf16.msra.mxu0 %v1398_v33  ;;  %v1277_v27 = vunpack.c.l.s8.bf16 %v1135_v3 }
 0x204   :  { %1716 = vmatprep.subr.bf16.mxu0 %v1401_v37  ;;  %v2489_v8 = vrot.slane %v2441_v14, %v886_v5  ;;  %v2501_v13 = vrot.slane %v2453_v17, %v886_v5  ;;  %v2548_v37 = vsub.s32 1, %v2433_v9 }
 0x206   :  { %1529 = vmatpush1.bf16.msra.mxu1 %v1256_v7  ;;  %v2485_v7 = vld [vmem:[%s2677_s3 + $0x8] sm:$0xff] }
 0x207   :  { %1530 = vmatprep.subr.bf16.mxu1 %v1259_v21  ;;  %1717 = vmatpush1.bf16.msra.mxu0 %v1400_v42  ;;  %v890_v21 = vsub.s32 7, %v2433_v9  ;;  %v2508_v18 = vrot.slane %v2485_v7, %v2444_v16 }
 0x208   :  { %1718 = vmatprep.subr.bf16.mxu0 %v1403_v47 }
 0x209   :  { %v2504_v15 = vrot.slane %v2441_v14, %v890_v21  ;;  %v2539_v33 = vrot.slane %v2485_v7, %v890_v21 }
 0x20a   :  { %1531 = vmatpush1.bf16.msra.mxu1 %v1258_v10  ;;  %v2493_v10 = vrot.slane %v2485_v7, %v2436_v11 }
 0x20b   :  { %1532 = vmatprep.subr.bf16.mxu1 %v1261_v12  ;;  %1719 = vmatpush1.bf16.msra.mxu0 %v1402_v52  ;;  %v2498_v12 = vld [vmem:[%s2678_s4 + $0x8] sm:$0xff] }
 0x20c   :  { %1720 = vmatprep.subr.bf16.mxu0 %v1405_v55  ;;  %v2512_v22 = vrot.slane %v2498_v12, %v2436_v11  ;;  %v2519_v26 = vrot.slane %v2498_v12, %v2444_v16  ;;  %v2526_v11 = vrot.slane %v2485_v7, %v2468_v45  ;;  %v2533_v16 = vrot.slane %v2485_v7, %v886_v5 }
 0x20d   :  { %v2536_v32 = vrot.slane %v2498_v12, %v886_v5  ;;  %v2542_v35 = vrot.slane %v2498_v12, %v890_v21 }
 0x20e   :  { %1533 = vmatpush1.bf16.msra.mxu1 %v1260_v19  ;;  %v1276_v19 = vunpack.c.l.s8.bf16 %v1134_v6 }
 0x20f   :  { %1534 = vmatprep.subr.bf16.mxu1 %v1263_v24  ;;  %1721 = vmatpush1.bf16.msra.mxu0 %v1404_v58  ;;  %v2515_v24 = vrot.slane %v2453_v17, %v890_v21 }
 0x210   :  { %1722 = vmatprep.subr.bf16.mxu0 %v1407_v61 }
 0x212   :  { %1535 = vmatpush1.bf16.msra.mxu1 %v1262_v29  ;;  %v1278_v29 = vunpack.c.h.s8.bf16 %v1134_v6 }
 0x213   :  { %1536 = vmatprep.subr.bf16.mxu1 %v1265_v31  ;;  %1723 = vmatpush1.bf16.msra.mxu0 %v1406_v0  ;;  %v2530_v31 = vrot.slane %v2498_v12, %v2468_v45 }
 0x214   :  { %1735 = vmatprep.subr.bf16.mxu0 %v1409_v48 }
 0x216   :  { %1537 = vmatpush1.bf16.msra.mxu1 %v1264_v36  ;;  %v2545_v36 = vsub.s32 0, %v2433_v9 }
 0x217   :  { %1538 = vmatprep.subr.bf16.mxu1 %v1267_v40  ;;  %v867_v40 = vrot.slane %v2441_v14, %v2548_v37 }
 0x218   :  { %v863_v38 = vrot.slane %v2441_v14, %v2545_v36  ;;  %v979_v42 = vrot.slane %v2453_v17, %v2545_v36 }
 0x21a   :  { %1539 = vmatpush1.bf16.msra.mxu1 %v1266_v46  ;;  %v983_v46 = vrot.slane %v2453_v17, %v2548_v37 }
 0x21b   :  { %1540 = vmatprep.subr.bf16.mxu1 %v1269_v49 }
 0x21e   :  { %1541 = vmatpush1.bf16.msra.mxu1 %v1268_v1 }
 0x21f   :  { %1542 = vmatprep.subr.bf16.mxu1 %v1271_v57 }
 0x222   :  { %1543 = vmatpush1.bf16.msra.mxu1 %v1270_v60 }
 0x223   :  { %1544 = vmatprep.subr.bf16.mxu1 %v1273_v62 }
 0x226   :  { %1545 = vmatpush1.bf16.msra.mxu1 %v1272_v44 }
 0x227   :  { %1546 = vmatprep.subr.bf16.mxu1 %v1275_v2 }
 0x22a   :  { %1547 = vmatpush1.bf16.msra.mxu1 %v1274_v4 }
 0x22b   :  { %1548 = vmatprep.subr.bf16.mxu1 %v1277_v27 }
 0x22e   :  { %1549 = vmatpush1.bf16.msra.mxu1 %v1276_v19 }
 0x22f   :  { %1550 = vmatprep.subr.bf16.mxu1 %v1279_v23  ;;  %v1136_v23 = vld [vmem:[#allocation5 + $0x80] sm:$0xff] }
 0x232   :  { %1551 = vmatpush1.bf16.msra.mxu1 %v1278_v29 }
 0x233   :  { %1563 = vmatprep.subr.bf16.mxu1 %v1281_v30 }
 0x288   :  { %v546_v43 = vpop.f32.mrb[0].mxu1  ;;  %v632_v45 = vpop.f32.mrb[4].mxu0 }
 0x289   :  { %v940_v47 = vmul.f32 %v863_v38, %v546_v43  ;;  %v944_v49 = vmul.f32 %v2448_v39, %v632_v45  ;;  %v548_v50 = vpop.f32.mrb[1].mxu1  ;;  %v634_v52 = vpop.f32.mrb[5].mxu0 }
 0x28a   :  { %v941_v54 = vmul.f32 %v867_v40, %v548_v50  ;;  %v945_v1 = vmul.f32 %v2457_v34, %v634_v52  ;;  %v550_v55 = vpop.f32.mrb[2].mxu1  ;;  %v636_v56 = vpop.f32.mrb[6].mxu0  ;;  %v899_v50 = vrot.slane %v2485_v7, %v2548_v37  ;;  %v1282_v52 = vunpack.c.h.s8.bf16 %v1136_v23 }
 0x28b   :  { %v1056_v57 = vadd.f32 %v979_v42, %v940_v47  ;;  %v1060_v58 = vadd.f32 %v2461_v20, %v944_v49  ;;  %v956_v59 = vmul.f32 %v863_v38, %v550_v55  ;;  %v960_v60 = vmul.f32 %v2448_v39, %v636_v56  ;;  %v552_v61 = vpop.f32.mrb[3].mxu1  ;;  %v638_v62 = vpop.f32.mrb[7].mxu0 }
 0x28c   :  { %v1057_v63 = vadd.f32 %v983_v46, %v941_v54  ;;  %v1061_v0 = vadd.f32 %v2465_v25, %v945_v1  ;;  %v957_v44 = vmul.f32 %v867_v40, %v552_v61  ;;  %v961_v48 = vmul.f32 %v2457_v34, %v638_v62 }
 0x28d   :  { %v1072_v2 = vadd.f32 %v979_v42, %v956_v59  ;;  %v1076_v3 = vadd.f32 %v2461_v20, %v960_v60  ;;  %v1088_v27 = vmax.f32 %v1056_v57, 0.0  ;;  %v1092_v6 = vmax.f32 %v1060_v58, 0.0 }
 0x28e   :  { %v1073_v4 = vadd.f32 %v983_v46, %v957_v44  ;;  %v1077_v5 = vadd.f32 %v2465_v25, %v961_v48  ;;  %v1089_v39 = vmax.f32 %v1057_v63, 0.0  ;;  %v1093_v29 = vmax.f32 %v1061_v0, 0.0  ;;  %v1139_v46 = vld [vmem:[#allocation5 + $0x98] sm:$0xff] }
 0x28f   :  { %v1104_v21 = vmax.f32 %v1072_v2, 0.0  ;;  %v1108_v19 = vmax.f32 %v1076_v3, 0.0  ;;  %v1280_v34 = vunpack.c.l.s8.bf16 %v1136_v23  ;;  %v2569_v42 = vsub.s32 3, %v2433_v9 }
 0x290   :  { %v1105_v30 = vmax.f32 %v1073_v4, 0.0  ;;  %v1109_v38 = vmax.f32 %v1077_v5, 0.0  ;;  %v1283_v25 = vunpack.c.h.s8.bf16 %v2521_v28  ;;  %v895_v47 = vrot.slane %v2485_v7, %v2545_v36  ;;  %v1138_v28 = vld [vmem:[#allocation5 + $0x90] sm:$0xff] }
 0x291   :  { %v1504_v43 = vpack.c.bf16 %v1104_v21, %v1088_v27  ;;  %v2566_v45 = vpack.c.bf16 %v1108_v19, %v1092_v6  ;;  %v875_v49 = vrot.slane %v2441_v14, %v2569_v42  ;;  %v1011_v9 = vrot.slane %v2498_v12, %v2545_v36  ;;  %v1141_v6 = vld [vmem:[#allocation5 + $0xa8] sm:$0xff] }
 0x292   :  { %v1505_v40 = vpack.c.bf16 %v1105_v30, %v1089_v39  ;;  %v2571_v20 = vpack.c.bf16 %v1109_v38, %v1093_v29  ;;  %v1285_v54 = vunpack.c.l.s8.bf16 %v1139_v46  ;;  %v991_v56 = vrot.slane %v2453_v17, %v2569_v42 }
 0x293   :  { %v1015_v57 = vrot.slane %v2498_v12, %v2548_v37  ;;  %v1284_v44 = vunpack.c.l.s8.bf16 %v1138_v28  ;;  %v1287_v48 = vunpack.c.h.s8.bf16 %v1139_v46 }
 0x294   :  { %1552 = vmatprep.mubr.bf16.mxu1 %v1505_v40  ;;  %v1286_v40 = vunpack.c.h.s8.bf16 %v1138_v28 }
 0x295   :  { %1553 = vmatmul.mubr.bf16.vlgmr.msra.gmra.mrb[20].mxu1 %v1504_v43 }
 0x296   :  { %1564 = vmatpush1.bf16.msra.mxu1 %v1280_v34  ;;  %v1289_v34 = vunpack.c.l.s8.bf16 %v1141_v6 }
 0x297   :  { %1565 = vmatprep.subr.bf16.mxu1 %v1283_v25 }
 0x298   :  { %v589_v1 = vpop.f32.mrb[4].mxu1  ;;  %v718_v55 = vpop.f32.mrb[8].mxu0 }
 0x299   :  { %v942_v14 = vmul.f32 %v2472_v51, %v589_v1  ;;  %v948_v58 = vmul.f32 %v895_v47, %v718_v55  ;;  %v591_v59 = vpop.f32.mrb[5].mxu1  ;;  %v720_v60 = vpop.f32.mrb[9].mxu0 }
 0x29a   :  { %v943_v61 = vmul.f32 %v875_v49, %v591_v59  ;;  %v949_v62 = vmul.f32 %v899_v50, %v720_v60  ;;  %v593_v63 = vpop.f32.mrb[6].mxu1  ;;  %v722_v0 = vpop.f32.mrb[10].mxu0  ;;  %1566 = vmatpush1.bf16.msra.mxu1 %v1282_v52  ;;  %v1200_v52 = vld [vmem:[#allocation5 + $0x280] sm:$0xff]  ;;  %v1291_v59 = vunpack.c.h.s8.bf16 %v1141_v6  ;;  %v1203_v60 = vld [vmem:[#allocation5 + $0x298] sm:$0xff] }
 0x29b   :  { %v1058_v2 = vadd.f32 %v2476_v53, %v942_v14  ;;  %v1064_v3 = vadd.f32 %v1011_v9, %v948_v58  ;;  %v958_v17 = vmul.f32 %v2472_v51, %v593_v63  ;;  %v964_v4 = vmul.f32 %v895_v47, %v722_v0  ;;  %v595_v5 = vpop.f32.mrb[7].mxu1  ;;  %v724_v27 = vpop.f32.mrb[11].mxu0  ;;  %1567 = vmatprep.subr.bf16.mxu1 %v1285_v54  ;;  %v1140_v54 = vld [vmem:[#allocation5 + $0xa0] sm:$0xff]  ;;  %v1202_v0 = vld [vmem:[#allocation5 + $0x290] sm:$0xff] }
 0x29c   :  { %v1059_v21 = vadd.f32 %v991_v56, %v943_v61  ;;  %v1065_v19 = vadd.f32 %v1015_v57, %v949_v62  ;;  %v959_v23 = vmul.f32 %v875_v49, %v595_v5  ;;  %v965_v39 = vmul.f32 %v899_v50, %v724_v27  ;;  %v1143_v61 = vld [vmem:[#allocation5 + $0xb8] sm:$0xff] }
 0x29d   :  { %v1074_v29 = vadd.f32 %v2476_v53, %v958_v17  ;;  %v1080_v30 = vadd.f32 %v1011_v9, %v964_v4  ;;  %v1090_v25 = vmax.f32 %v1058_v2, 0.0  ;;  %v1096_v46 = vmax.f32 %v1064_v3, 0.0 }
 0x29e   :  { %v1075_v38 = vadd.f32 %v991_v56, %v959_v23  ;;  %v1081_v43 = vadd.f32 %v1015_v57, %v965_v39  ;;  %1568 = vmatpush1.bf16.msra.mxu1 %v1284_v44  ;;  %v1091_v1 = vmax.f32 %v1059_v21, 0.0  ;;  %v1097_v55 = vmax.f32 %v1065_v19, 0.0  ;;  %v1142_v44 = vld [vmem:[#allocation5 + $0xb0] sm:$0xff] }
 0x29f   :  { %v1106_v51 = vmax.f32 %v1074_v29, 0.0  ;;  %v1112_v47 = vmax.f32 %v1080_v30, 0.0  ;;  %1569 = vmatprep.subr.bf16.mxu1 %v1287_v48  ;;  %v1408_v57 = vunpack.c.l.s8.bf16 %v1200_v52  ;;  %v1288_v28 = vunpack.c.l.s8.bf16 %v1140_v54 }
 0x2a0   :  { %v1107_v14 = vmax.f32 %v1075_v38, 0.0  ;;  %v1113_v49 = vmax.f32 %v1081_v43, 0.0  ;;  %v1411_v58 = vunpack.c.h.s8.bf16 %v2478_v41  ;;  %v1410_v62 = vunpack.c.h.s8.bf16 %v1200_v52  ;;  %v1145_v52 = vld [vmem:[#allocation5 + $0xc8] sm:$0xff] }
 0x2a1   :  { %v2590_v50 = vpack.c.bf16 %v1106_v51, %v1090_v25  ;;  %v1512_v53 = vpack.c.bf16 %v1112_v47, %v1096_v46  ;;  %v1290_v63 = vunpack.c.h.s8.bf16 %v1140_v54  ;;  %v1413_v48 = vunpack.c.l.s8.bf16 %v1203_v60  ;;  %v1205_v47 = vld [vmem:[#allocation5 + $0x2a8] sm:$0xff] }
 0x2a2   :  { %1570 = vmatpush1.bf16.msra.mxu1 %v1286_v40  ;;  %v1507_v9 = vpack.c.bf16 %v1107_v14, %v1091_v1  ;;  %v1513_v56 = vpack.c.bf16 %v1113_v49, %v1097_v55  ;;  %v1293_v17 = vunpack.c.l.s8.bf16 %v1143_v61  ;;  %v1412_v6 = vunpack.c.l.s8.bf16 %v1202_v0 }
 0x2a3   :  { %1571 = vmatprep.subr.bf16.mxu1 %v1289_v34  ;;  %v1292_v21 = vunpack.c.l.s8.bf16 %v1142_v44  ;;  %v1415_v30 = vunpack.c.h.s8.bf16 %v1203_v60  ;;  %v1295_v38 = vunpack.c.h.s8.bf16 %v1143_v61 }
 0x2a4   :  { %1595 = vmatprep.mubr.bf16.mxu1 %v1507_v9  ;;  %1724 = vmatprep.mubr.bf16.mxu0 %v1513_v56 }
 0x2a5   :  { %1725 = vmatmul.mubr.bf16.vlgmr.msra.gmra.mrb[16].mxu0 %v1512_v53  ;;  %v1414_v53 = vunpack.c.h.s8.bf16 %v1202_v0 }
 0x2a6   :  { %1736 = vmatpush1.bf16.msra.mxu0 %v1408_v57  ;;  %1572 = vmatpush1.bf16.msra.mxu1 %v1288_v28  ;;  %v1417_v57 = vunpack.c.l.s8.bf16 %v1205_v47  ;;  %v1297_v28 = vunpack.c.l.s8.bf16 %v1145_v52 }
 0x2a7   :  { %1737 = vmatprep.subr.bf16.mxu0 %v1411_v58  ;;  %1573 = vmatprep.subr.bf16.mxu1 %v1291_v59 }
 0x2a8   :  { %v675_v2 = vpop.f32.mrb[8].mxu1  ;;  %v804_v3 = vpop.f32.mrb[12].mxu0 }
 0x2a9   :  { %v946_v41 = vmul.f32 %v2489_v8, %v675_v2  ;;  %v952_v4 = vmul.f32 %v2493_v10, %v804_v3  ;;  %v677_v5 = vpop.f32.mrb[9].mxu1  ;;  %v806_v27 = vpop.f32.mrb[13].mxu0  ;;  %v1419_v3 = vunpack.c.h.s8.bf16 %v1205_v47 }
 0x2aa   :  { %v947_v19 = vmul.f32 %v2504_v15, %v677_v5  ;;  %v953_v23 = vmul.f32 %v2508_v18, %v806_v27  ;;  %1738 = vmatpush1.bf16.msra.mxu0 %v1410_v62  ;;  %v679_v39 = vpop.f32.mrb[10].mxu1  ;;  %v808_v29 = vpop.f32.mrb[14].mxu0  ;;  %1574 = vmatpush1.bf16.msra.mxu1 %v1290_v63  ;;  %v907_v5 = vrot.slane %v2485_v7, %v2569_v42 }
 0x2ab   :  { %v1062_v43 = vadd.f32 %v2501_v13, %v946_v41  ;;  %v1068_v40 = vadd.f32 %v2512_v22, %v952_v4  ;;  %v962_v34 = vmul.f32 %v2489_v8, %v679_v39  ;;  %v968_v25 = vmul.f32 %v2493_v10, %v808_v29  ;;  %v681_v46 = vpop.f32.mrb[11].mxu1  ;;  %v810_v51 = vpop.f32.mrb[15].mxu0  ;;  %1739 = vmatprep.subr.bf16.mxu0 %v1413_v48  ;;  %v1207_v41 = vld [vmem:[#allocation5 + $0x2b8] sm:$0xff]  ;;  %v1146_v39 = vld [vmem:[#allocation5 + $0xd0] sm:$0xff] }
 0x2ac   :  { %v1063_v54 = vadd.f32 %v2515_v24, %v947_v19  ;;  %v1069_v1 = vadd.f32 %v2519_v26, %v953_v23  ;;  %v963_v55 = vmul.f32 %v2504_v15, %v681_v46  ;;  %v969_v14 = vmul.f32 %v2508_v18, %v810_v51  ;;  %1575 = vmatprep.subr.bf16.mxu1 %v1293_v17  ;;  %v1204_v18 = vld [vmem:[#allocation5 + $0x2a0] sm:$0xff]  ;;  %v1147_v4 = vld [vmem:[#allocation5 + $0xd8] sm:$0xff]  ;;  %v1206_v23 = vld [vmem:[#allocation5 + $0x2b0] sm:$0xff] }
 0x2ad   :  { %v1078_v49 = vadd.f32 %v2501_v13, %v962_v34  ;;  %v1084_v8 = vadd.f32 %v2512_v22, %v968_v25  ;;  %v1294_v10 = vunpack.c.h.s8.bf16 %v1142_v44  ;;  %v1094_v58 = vmax.f32 %v1062_v43, 0.0  ;;  %v1144_v13 = vld [vmem:[#allocation5 + $0xc0] sm:$0xff] }
 0x2ae   :  { %v1079_v9 = vadd.f32 %v2515_v24, %v963_v55  ;;  %v1085_v56 = vadd.f32 %v2519_v26, %v969_v14  ;;  %1740 = vmatpush1.bf16.msra.mxu0 %v1412_v6  ;;  %1576 = vmatpush1.bf16.msra.mxu1 %v1292_v21  ;;  %v1100_v59 = vmax.f32 %v1068_v40, 0.0  ;;  %v1095_v61 = vmax.f32 %v1063_v54, 0.0  ;;  %v1149_v55 = vld [vmem:[#allocation5 + $0xe8] sm:$0xff] }
 0x2af   :  { %v1110_v15 = vmax.f32 %v1078_v49, 0.0  ;;  %v1116_v60 = vmax.f32 %v1084_v8, 0.0  ;;  %1741 = vmatprep.subr.bf16.mxu0 %v1415_v30  ;;  %1577 = vmatprep.subr.bf16.mxu1 %v1295_v38  ;;  %v1101_v22 = vmax.f32 %v1069_v1, 0.0  ;;  %v1416_v26 = vunpack.c.l.s8.bf16 %v1204_v18 }
 0x2b0   :  { %v1111_v62 = vmax.f32 %v1079_v9, 0.0  ;;  %v1117_v63 = vmax.f32 %v1085_v56, 0.0  ;;  %v1296_v44 = vunpack.c.l.s8.bf16 %v1144_v13  ;;  %v1299_v17 = vunpack.c.h.s8.bf16 %v1145_v52 }
 0x2b1   :  { %v2609_v0 = vpack.c.bf16 %v1110_v15, %v1094_v58  ;;  %v2611_v24 = vpack.c.bf16 %v1116_v60, %v1100_v59  ;;  %v1418_v27 = vunpack.c.h.s8.bf16 %v1204_v18  ;;  %v1298_v6 = vunpack.c.h.s8.bf16 %v1144_v13 }
 0x2b2   :  { %1742 = vmatpush1.bf16.msra.mxu0 %v1414_v53  ;;  %1578 = vmatpush1.bf16.msra.mxu1 %v1294_v10  ;;  %v2613_v48 = vpack.c.bf16 %v1117_v63, %v1101_v22  ;;  %v2615_v2 = vpack.c.bf16 %v1111_v62, %v1095_v61  ;;  %v1421_v21 = vunpack.c.l.s8.bf16 %v1207_v41  ;;  %v1301_v19 = vunpack.c.l.s8.bf16 %v1147_v4  ;;  %v1211_v22 = vld [vmem:[#allocation5 + $0x2d8] sm:$0xff] }
 0x2b3   :  { %1743 = vmatprep.subr.bf16.mxu0 %v1417_v57  ;;  %1579 = vmatprep.subr.bf16.mxu1 %v1297_v28  ;;  %v1023_v30 = vrot.slane %v2498_v12, %v2569_v42  ;;  %v1420_v7 = vunpack.c.l.s8.bf16 %v1206_v23  ;;  %v1300_v25 = vunpack.c.l.s8.bf16 %v1146_v39  ;;  %v1423_v52 = vunpack.c.h.s8.bf16 %v1207_v41  ;;  %v1209_v42 = vld [vmem:[#allocation5 + $0x2c8] sm:$0xff]  ;;  %v1208_v57 = vld [vmem:[#allocation5 + $0x2c0] sm:$0xff]  ;;  %v1151_v62 = vld [vmem:[#allocation5 + $0xf8] sm:$0xff] }
 0x2b4   :  { %v1303_v54 = vunpack.c.h.s8.bf16 %v1147_v4  ;;  %v1422_v8 = vunpack.c.h.s8.bf16 %v1206_v23  ;;  %v1302_v53 = vunpack.c.h.s8.bf16 %v1146_v39  ;;  %v1305_v56 = vunpack.c.l.s8.bf16 %v1149_v55  ;;  %v1148_v28 = vld [vmem:[#allocation5 + $0xe0] sm:$0xff]  ;;  %v1150_v41 = vld [vmem:[#allocation5 + $0xf0] sm:$0xff] }
 0x2b5   :  { %v1424_v60 = vunpack.c.l.s8.bf16 %v1208_v57  ;;  %v1304_v18 = vunpack.c.l.s8.bf16 %v1148_v28  ;;  %v1427_v13 = vunpack.c.h.s8.bf16 %v1209_v42  ;;  %v1307_v61 = vunpack.c.h.s8.bf16 %v1149_v55  ;;  %v1152_v55 = vld [vmem:[#allocation5 + $0x100] sm:$0xff] }
 0x2b6   :  { %1744 = vmatpush1.bf16.msra.mxu0 %v1416_v26  ;;  %1580 = vmatpush1.bf16.msra.mxu1 %v1296_v44  ;;  %v1426_v63 = vunpack.c.h.s8.bf16 %v1208_v57  ;;  %v1306_v26 = vunpack.c.h.s8.bf16 %v1148_v28  ;;  %v1429_v44 = vunpack.c.l.s8.bf16 %v1211_v22  ;;  %v1308_v23 = vunpack.c.l.s8.bf16 %v1150_v41 }
 0x2b7   :  { %1745 = vmatprep.subr.bf16.mxu0 %v1419_v3  ;;  %1581 = vmatprep.subr.bf16.mxu1 %v1299_v17  ;;  %v1309_v3 = vunpack.c.l.s8.bf16 %v1151_v62  ;;  %v1210_v17 = vld [vmem:[#allocation5 + $0x2d0] sm:$0xff]  ;;  %v1314_v57 = vunpack.c.h.s8.bf16 %v1152_v55 }
 0x2b8   :  { %v761_v29 = vpop.f32.mrb[12].mxu1 }
 0x2b9   :  { %v950_v38 = vmul.f32 %v2526_v11, %v761_v29  ;;  %v763_v43 = vpop.f32.mrb[13].mxu1 }
 0x2ba   :  { %v951_v40 = vmul.f32 %v907_v5, %v763_v43  ;;  %1746 = vmatpush1.bf16.msra.mxu0 %v1418_v27  ;;  %v765_v34 = vpop.f32.mrb[14].mxu1  ;;  %1582 = vmatpush1.bf16.msra.mxu1 %v1298_v6  ;;  %v1311_v43 = vunpack.c.h.s8.bf16 %v1151_v62 }
 0x2bb   :  { %v1066_v46 = vadd.f32 %v2530_v31, %v950_v38  ;;  %v966_v51 = vmul.f32 %v2526_v11, %v765_v34  ;;  %v767_v47 = vpop.f32.mrb[15].mxu1  ;;  %1747 = vmatprep.subr.bf16.mxu0 %v1421_v21  ;;  %1583 = vmatprep.subr.bf16.mxu1 %v1301_v19  ;;  %v1425_v11 = vunpack.c.l.s8.bf16 %v1209_v42  ;;  %v1428_v19 = vunpack.c.l.s8.bf16 %v1210_v17  ;;  %v1212_v42 = vld [vmem:[#allocation5 + $0x2e0] sm:$0xff] }
 0x2bc   :  { %v1067_v1 = vadd.f32 %v1023_v30, %v951_v40  ;;  %v967_v12 = vmul.f32 %v907_v5, %v767_v47  ;;  %v1431_v38 = vunpack.c.h.s8.bf16 %v1211_v22  ;;  %v1430_v47 = vunpack.c.h.s8.bf16 %v1210_v17  ;;  %v1157_v22 = vld [vmem:[#allocation5 + $0x128] sm:$0xff] }
 0x2bd   :  { %v1082_v14 = vadd.f32 %v2530_v31, %v966_v51  ;;  %v1098_v10 = vmax.f32 %v1066_v46, 0.0 }
 0x2be   :  { %v1083_v49 = vadd.f32 %v1023_v30, %v967_v12  ;;  %1748 = vmatpush1.bf16.msra.mxu0 %v1420_v7  ;;  %1584 = vmatpush1.bf16.msra.mxu1 %v1300_v25  ;;  %v1099_v58 = vmax.f32 %v1067_v1, 0.0  ;;  %v1213_v7 = vld [vmem:[#allocation5 + $0x2e8] sm:$0xff] }
 0x2bf   :  { %v1114_v9 = vmax.f32 %v1082_v14, 0.0  ;;  %1749 = vmatprep.subr.bf16.mxu0 %v1423_v52  ;;  %1585 = vmatprep.subr.bf16.mxu1 %v1303_v54  ;;  %v1153_v25 = vld [vmem:[#allocation5 + $0x108] sm:$0xff]  ;;  %v1310_v52 = vunpack.c.h.s8.bf16 %v1150_v41  ;;  %v1433_v1 = vunpack.c.l.s8.bf16 %v1213_v7 }
 0x2c0   :  { %v1115_v59 = vmax.f32 %v1083_v49, 0.0  ;;  %v1313_v12 = vunpack.c.l.s8.bf16 %v1153_v25 }
 0x2c1   :  { %v2625_v15 = vpack.c.bf16 %v1114_v9, %v1098_v10  ;;  %v1315_v10 = vunpack.c.h.s8.bf16 %v1153_v25  ;;  %v1215_v9 = vld [vmem:[#allocation5 + $0x2f8] sm:$0xff] }
 0x2c2   :  { %1750 = vmatpush1.bf16.msra.mxu0 %v1422_v8  ;;  %1586 = vmatpush1.bf16.msra.mxu1 %v1302_v53  ;;  %v1515_v31 = vpack.c.bf16 %v1115_v59, %v1099_v58  ;;  %v1435_v53 = vunpack.c.h.s8.bf16 %v1213_v7  ;;  %v1437_v28 = vunpack.c.l.s8.bf16 %v1215_v9  ;;  %v1214_v59 = vld [vmem:[#allocation5 + $0x2f0] sm:$0xff]  ;;  %v1161_v7 = vld [vmem:[#allocation5 + $0x148] sm:$0xff] }
 0x2c3   :  { %1751 = vmatprep.subr.bf16.mxu0 %v1425_v11  ;;  %1587 = vmatprep.subr.bf16.mxu1 %v1305_v56  ;;  %v1155_v11 = vld [vmem:[#allocation5 + $0x118] sm:$0xff]  ;;  %v1434_v56 = vunpack.c.h.s8.bf16 %v1212_v42  ;;  %v1438_v62 = vunpack.c.h.s8.bf16 %v1214_v59 }
 0x2c4   :  { %1767 = vmatprep.mubr.bf16.mxu0 %v1515_v31  ;;  %v1317_v58 = vunpack.c.l.s8.bf16 %v1155_v11  ;;  %v1154_v31 = vld [vmem:[#allocation5 + $0x110] sm:$0xff] }
 0x2c6   :  { %1752 = vmatpush1.bf16.msra.mxu0 %v1424_v60  ;;  %1588 = vmatpush1.bf16.msra.mxu1 %v1304_v18  ;;  %v1436_v60 = vunpack.c.l.s8.bf16 %v1214_v59  ;;  %v1316_v18 = vunpack.c.l.s8.bf16 %v1154_v31 }
 0x2c7   :  { %1753 = vmatprep.subr.bf16.mxu0 %v1427_v13  ;;  %1589 = vmatprep.subr.bf16.mxu1 %v1307_v61  ;;  %v1439_v13 = vunpack.c.h.s8.bf16 %v1215_v9  ;;  %v1217_v61 = vld [vmem:[#allocation5 + $0x308] sm:$0xff] }
 0x2c8   :  { %v847_v4 = vpop.f32.mrb[16].mxu1 }
 0x2c9   :  { %v954_v5 = vmul.f32 %v2533_v16, %v847_v4  ;;  %v849_v27 = vpop.f32.mrb[17].mxu1  ;;  %v1443_v4 = vunpack.c.h.s8.bf16 %v1217_v61 }
 0x2ca   :  { %v955_v6 = vmul.f32 %v2539_v33, %v849_v27  ;;  %1754 = vmatpush1.bf16.msra.mxu0 %v1426_v63  ;;  %v851_v21 = vpop.f32.mrb[18].mxu1  ;;  %1590 = vmatpush1.bf16.msra.mxu1 %v1306_v26  ;;  %v1441_v63 = vunpack.c.l.s8.bf16 %v1217_v61  ;;  %v1321_v26 = vunpack.c.l.s8.bf16 %v1157_v22  ;;  %v1219_v27 = vld [vmem:[#allocation5 + $0x318] sm:$0xff] }
 0x2cb   :  { %v1070_v39 = vadd.f32 %v2536_v32, %v954_v5  ;;  %v970_v29 = vmul.f32 %v2533_v16, %v851_v21  ;;  %v853_v30 = vpop.f32.mrb[19].mxu1  ;;  %1755 = vmatprep.subr.bf16.mxu0 %v1429_v44  ;;  %1591 = vmatprep.subr.bf16.mxu1 %v1309_v3  ;;  %v1216_v44 = vld [vmem:[#allocation5 + $0x300] sm:$0xff]  ;;  %v1323_v5 = vunpack.c.h.s8.bf16 %v1157_v22 }
 0x2cc   :  { %v1071_v40 = vadd.f32 %v2542_v35, %v955_v6  ;;  %v971_v34 = vmul.f32 %v2539_v33, %v853_v30  ;;  %v1156_v3 = vld [vmem:[#allocation5 + $0x120] sm:$0xff]  ;;  %v1440_v17 = vunpack.c.l.s8.bf16 %v1216_v44  ;;  %v1159_v6 = vld [vmem:[#allocation5 + $0x138] sm:$0xff]  ;;  %v1442_v21 = vunpack.c.h.s8.bf16 %v1216_v44  ;;  %v1158_v30 = vld [vmem:[#allocation5 + $0x130] sm:$0xff] }
 0x2cd   :  { %v1086_v46 = vadd.f32 %v2536_v32, %v970_v29  ;;  %v1102_v16 = vmax.f32 %v1070_v39, 0.0  ;;  %v1432_v32 = vunpack.c.l.s8.bf16 %v1212_v42  ;;  %v1320_v41 = vunpack.c.l.s8.bf16 %v1156_v3  ;;  %v1218_v39 = vld [vmem:[#allocation5 + $0x310] sm:$0xff]  ;;  %v1223_v42 = vld [vmem:[#allocation5 + $0x338] sm:$0xff] }
 0x2ce   :  { %v1087_v51 = vadd.f32 %v2542_v35, %v971_v34  ;;  %1756 = vmatpush1.bf16.msra.mxu0 %v1428_v19  ;;  %1592 = vmatpush1.bf16.msra.mxu1 %v1308_v23  ;;  %v1103_v14 = vmax.f32 %v1071_v40, 0.0  ;;  %v1312_v35 = vunpack.c.l.s8.bf16 %v1152_v55  ;;  %v1322_v19 = vunpack.c.h.s8.bf16 %v1156_v3  ;;  %v1221_v34 = vld [vmem:[#allocation5 + $0x328] sm:$0xff]  ;;  %v1163_v55 = vld [vmem:[#allocation5 + $0x158] sm:$0xff] }
 0x2cf   :  { %v1118_v54 = vmax.f32 %v1086_v46, 0.0  ;;  %1757 = vmatprep.subr.bf16.mxu0 %v1431_v38  ;;  %1593 = vmatprep.subr.bf16.mxu1 %v1311_v43  ;;  %v1445_v23 = vunpack.c.l.s8.bf16 %v1219_v27  ;;  %v1325_v29 = vunpack.c.l.s8.bf16 %v1159_v6  ;;  %v1444_v38 = vunpack.c.l.s8.bf16 %v1218_v39 }
 0x2d0   :  { %v1119_v33 = vmax.f32 %v1087_v51, 0.0  ;;  %v1324_v43 = vunpack.c.l.s8.bf16 %v1158_v30  ;;  %v1447_v40 = vunpack.c.h.s8.bf16 %v1219_v27  ;;  %v1326_v25 = vunpack.c.h.s8.bf16 %v1158_v30  ;;  %v1220_v51 = vld [vmem:[#allocation5 + $0x320] sm:$0xff] }
 0x2d1   :  { %v2635_v49 = vpack.c.bf16 %v1118_v54, %v1102_v16  ;;  %v1449_v46 = vunpack.c.l.s8.bf16 %v1221_v34  ;;  %v1448_v16 = vunpack.c.l.s8.bf16 %v1220_v51 }
 0x2d2   :  { %1758 = vmatpush1.bf16.msra.mxu0 %v1430_v47  ;;  %1594 = vmatpush1.bf16.msra.mxu1 %v1310_v52  ;;  %v2637_v8 = vpack.c.bf16 %v1119_v33, %v1103_v14  ;;  %v1329_v47 = vunpack.c.l.s8.bf16 %v1161_v7  ;;  %v1160_v52 = vld [vmem:[#allocation5 + $0x140] sm:$0xff]  ;;  %v1450_v14 = vunpack.c.h.s8.bf16 %v1220_v51  ;;  %v1171_v51 = vld [vmem:[#allocation5 + $0x198] sm:$0xff] }
 0x2d3   :  { %1759 = vmatprep.subr.bf16.mxu0 %v1433_v1  ;;  %1606 = vmatprep.subr.bf16.mxu1 %v1313_v12  ;;  %v1328_v54 = vunpack.c.l.s8.bf16 %v1160_v52  ;;  %v1451_v1 = vunpack.c.h.s8.bf16 %v1221_v34  ;;  %v1331_v12 = vunpack.c.h.s8.bf16 %v1161_v7  ;;  %v1330_v33 = vunpack.c.h.s8.bf16 %v1160_v52 }
 0x2d5   :  { %1596 = vmatmul.mubr.bf16.vlgmr.msra.gmra.mrb[20].mxu1 %v2590_v50  ;;  %v1319_v50 = vunpack.c.h.s8.bf16 %v1155_v11 }
 0x2d6   :  { %1760 = vmatpush1.bf16.msra.mxu0 %v1432_v32  ;;  %1607 = vmatpush1.bf16.msra.mxu1 %v1312_v35  ;;  %v1453_v32 = vunpack.c.l.s8.bf16 %v1223_v42  ;;  %v1222_v35 = vld [vmem:[#allocation5 + $0x330] sm:$0xff] }
 0x2d7   :  { %1638 = vmatprep.mubr.bf16.mxu1 %v2571_v20  ;;  %1761 = vmatprep.subr.bf16.mxu0 %v1435_v53  ;;  %v1318_v20 = vunpack.c.h.s8.bf16 %v1154_v31  ;;  %v1333_v53 = vunpack.c.l.s8.bf16 %v1163_v55  ;;  %v1452_v9 = vunpack.c.l.s8.bf16 %v1222_v35  ;;  %v1454_v59 = vunpack.c.h.s8.bf16 %v1222_v35 }
 0x2d8   :  { %1608 = vmatprep.subr.bf16.mxu1 %v1315_v10  ;;  %v1162_v10 = vld [vmem:[#allocation5 + $0x150] sm:$0xff] }
 0x2d9   :  { %v1332_v11 = vunpack.c.l.s8.bf16 %v1162_v10  ;;  %v1334_v31 = vunpack.c.h.s8.bf16 %v1162_v10  ;;  %v1232_v10 = vld [vmem:[#allocation5 + $0x380] sm:$0xff] }
 0x2da   :  { %1762 = vmatpush1.bf16.msra.mxu0 %v1434_v56  ;;  %1609 = vmatpush1.bf16.msra.mxu1 %v1314_v57  ;;  %v1455_v56 = vunpack.c.h.s8.bf16 %v1223_v42  ;;  %v1335_v57 = vunpack.c.h.s8.bf16 %v1163_v55 }
 0x2db   :  { %1763 = vmatprep.subr.bf16.mxu0 %v1437_v28  ;;  %1610 = vmatprep.subr.bf16.mxu1 %v1317_v58  ;;  %v1225_v28 = vld [vmem:[#allocation5 + $0x348] sm:$0xff] }
 0x2dc   :  { %v1165_v58 = vld [vmem:[#allocation5 + $0x168] sm:$0xff] }
 0x2de   :  { %1764 = vmatpush1.bf16.msra.mxu0 %v1436_v60  ;;  %1611 = vmatpush1.bf16.msra.mxu1 %v1316_v18  ;;  %v1457_v60 = vunpack.c.l.s8.bf16 %v1225_v28  ;;  %v1224_v18 = vld [vmem:[#allocation5 + $0x340] sm:$0xff] }
 0x2df   :  { %1765 = vmatprep.subr.bf16.mxu0 %v1439_v13  ;;  %1612 = vmatprep.subr.bf16.mxu1 %v1319_v50  ;;  %v1337_v13 = vunpack.c.l.s8.bf16 %v1165_v58  ;;  %v1164_v50 = vld [vmem:[#allocation5 + $0x160] sm:$0xff]  ;;  %v1456_v61 = vunpack.c.l.s8.bf16 %v1224_v18  ;;  %v1458_v44 = vunpack.c.h.s8.bf16 %v1224_v18 }
 0x2e0   :  { %v1336_v22 = vunpack.c.l.s8.bf16 %v1164_v50  ;;  %v1338_v3 = vunpack.c.h.s8.bf16 %v1164_v50  ;;  %v1234_v50 = vld [vmem:[#allocation5 + $0x390] sm:$0xff] }
 0x2e2   :  { %1766 = vmatpush1.bf16.msra.mxu0 %v1438_v62  ;;  %1613 = vmatpush1.bf16.msra.mxu1 %v1318_v20  ;;  %v1459_v62 = vunpack.c.h.s8.bf16 %v1225_v28  ;;  %v1339_v20 = vunpack.c.h.s8.bf16 %v1165_v58 }
 0x2e3   :  { %1778 = vmatprep.subr.bf16.mxu0 %v1441_v63  ;;  %1614 = vmatprep.subr.bf16.mxu1 %v1321_v26  ;;  %v1227_v63 = vld [vmem:[#allocation5 + $0x358] sm:$0xff] }
 0x2e4   :  { %v1167_v26 = vld [vmem:[#allocation5 + $0x178] sm:$0xff] }
 0x2e5   :  { %1768 = vmatmul.mubr.bf16.vlgmr.msra.gmra.mrb[16].mxu0 %v2625_v15  ;;  %v1327_v15 = vunpack.c.h.s8.bf16 %v1159_v6 }
 0x2e6   :  { %1779 = vmatpush1.bf16.msra.mxu0 %v1440_v17  ;;  %1810 = vmatprep.mubr.bf16.mxu0 %v2613_v48  ;;  %v1446_v48 = vunpack.c.h.s8.bf16 %v1218_v39  ;;  %v1461_v17 = vunpack.c.l.s8.bf16 %v1227_v63  ;;  %v1169_v39 = vld [vmem:[#allocation5 + $0x188] sm:$0xff] }
 0x2e7   :  { %1615 = vmatpush1.bf16.msra.mxu1 %v1320_v41  ;;  %1780 = vmatprep.subr.bf16.mxu0 %v1443_v4  ;;  %v1226_v41 = vld [vmem:[#allocation5 + $0x350] sm:$0xff]  ;;  %v1341_v4 = vunpack.c.l.s8.bf16 %v1167_v26 }
 0x2e8   :  { %1616 = vmatprep.subr.bf16.mxu1 %v1323_v5  ;;  %v1166_v5 = vld [vmem:[#allocation5 + $0x170] sm:$0xff]  ;;  %v1460_v27 = vunpack.c.l.s8.bf16 %v1226_v41 }
 0x2e9   :  { %v1340_v6 = vunpack.c.l.s8.bf16 %v1166_v5  ;;  %v1342_v30 = vunpack.c.h.s8.bf16 %v1166_v5  ;;  %v1176_v5 = vld [vmem:[#allocation5 + $0x1c0] sm:$0xff] }
 0x2ea   :  { %1781 = vmatpush1.bf16.msra.mxu0 %v1442_v21  ;;  %v1463_v21 = vunpack.c.h.s8.bf16 %v1227_v63 }
 0x2eb   :  { %1617 = vmatpush1.bf16.msra.mxu1 %v1322_v19  ;;  %1782 = vmatprep.subr.bf16.mxu0 %v1445_v23  ;;  %v1343_v19 = vunpack.c.h.s8.bf16 %v1167_v26  ;;  %v1229_v23 = vld [vmem:[#allocation5 + $0x368] sm:$0xff] }
 0x2ec   :  { %1618 = vmatprep.subr.bf16.mxu1 %v1325_v29  ;;  %v1462_v29 = vunpack.c.h.s8.bf16 %v1226_v41  ;;  %v1237_v26 = vld [vmem:[#allocation5 + $0x3a8] sm:$0xff]  ;;  %v1236_v41 = vld [vmem:[#allocation5 + $0x3a0] sm:$0xff] }
 0x2ee   :  { %1783 = vmatpush1.bf16.msra.mxu0 %v1444_v38  ;;  %v1465_v38 = vunpack.c.l.s8.bf16 %v1229_v23 }
 0x2ef   :  { %1619 = vmatpush1.bf16.msra.mxu1 %v1324_v43  ;;  %1784 = vmatprep.subr.bf16.mxu0 %v1447_v40  ;;  %v1228_v43 = vld [vmem:[#allocation5 + $0x360] sm:$0xff]  ;;  %v1345_v40 = vunpack.c.l.s8.bf16 %v1169_v39 }
 0x2f0   :  { %1620 = vmatprep.subr.bf16.mxu1 %v1327_v15  ;;  %v1168_v15 = vld [vmem:[#allocation5 + $0x180] sm:$0xff]  ;;  %v1464_v34 = vunpack.c.l.s8.bf16 %v1228_v43 }
 0x2f1   :  { %v1344_v7 = vunpack.c.l.s8.bf16 %v1168_v15  ;;  %v1346_v52 = vunpack.c.h.s8.bf16 %v1168_v15  ;;  %v1178_v15 = vld [vmem:[#allocation5 + $0x1d0] sm:$0xff] }
 0x2f2   :  { %1785 = vmatpush1.bf16.msra.mxu0 %v1446_v48  ;;  %v1467_v48 = vunpack.c.h.s8.bf16 %v1229_v23  ;;  %v1239_v23 = vld [vmem:[#allocation5 + $0x3b8] sm:$0xff] }
 0x2f3   :  { %1621 = vmatpush1.bf16.msra.mxu1 %v1326_v25  ;;  %1786 = vmatprep.subr.bf16.mxu0 %v1449_v46  ;;  %v1347_v25 = vunpack.c.h.s8.bf16 %v1169_v39  ;;  %v1231_v46 = vld [vmem:[#allocation5 + $0x378] sm:$0xff] }
 0x2f4   :  { %1622 = vmatprep.subr.bf16.mxu1 %v1329_v47  ;;  %v1466_v47 = vunpack.c.h.s8.bf16 %v1228_v43  ;;  %v1179_v39 = vld [vmem:[#allocation5 + $0x1d8] sm:$0xff]  ;;  %v1238_v43 = vld [vmem:[#allocation5 + $0x3b0] sm:$0xff] }
 0x2f6   :  { %1787 = vmatpush1.bf16.msra.mxu0 %v1448_v16  ;;  %v1469_v16 = vunpack.c.l.s8.bf16 %v1231_v46 }
 0x2f7   :  { %1623 = vmatpush1.bf16.msra.mxu1 %v1328_v54  ;;  %1788 = vmatprep.subr.bf16.mxu0 %v1451_v1  ;;  %v1230_v54 = vld [vmem:[#allocation5 + $0x370] sm:$0xff]  ;;  %v1349_v1 = vunpack.c.l.s8.bf16 %v1171_v51 }
 0x2f8   :  { %1624 = vmatprep.subr.bf16.mxu1 %v1331_v12  ;;  %v1170_v12 = vld [vmem:[#allocation5 + $0x190] sm:$0xff]  ;;  %v1468_v42 = vunpack.c.l.s8.bf16 %v1230_v54  ;;  %v1470_v35 = vunpack.c.h.s8.bf16 %v1230_v54  ;;  %v1240_v54 = vld [vmem:[#allocation5 + $0x3c0] sm:$0xff] }
 0x2f9   :  { %v1348_v55 = vunpack.c.l.s8.bf16 %v1170_v12 }
 0x2fa   :  { %1789 = vmatpush1.bf16.msra.mxu0 %v1450_v14  ;;  %v1471_v14 = vunpack.c.h.s8.bf16 %v1231_v46  ;;  %v1241_v46 = vld [vmem:[#allocation5 + $0x3c8] sm:$0xff] }
 0x2fb   :  { %1625 = vmatpush1.bf16.msra.mxu1 %v1330_v33  ;;  %1790 = vmatprep.subr.bf16.mxu0 %v1453_v32  ;;  %v1233_v33 = vld [vmem:[#allocation5 + $0x388] sm:$0xff] }
 0x2fc   :  { %1626 = vmatprep.subr.bf16.mxu1 %v1333_v53  ;;  %v1173_v32 = vld [vmem:[#allocation5 + $0x1a8] sm:$0xff]  ;;  %v1473_v53 = vunpack.c.l.s8.bf16 %v1233_v33  ;;  %v1475_v28 = vunpack.c.h.s8.bf16 %v1233_v33  ;;  %v1243_v33 = vld [vmem:[#allocation5 + $0x3d8] sm:$0xff] }
 0x2fd   :  { %v1355_v58 = vunpack.c.h.s8.bf16 %v1173_v32 }
 0x2fe   :  { %1791 = vmatpush1.bf16.msra.mxu0 %v1452_v9  ;;  %v1353_v9 = vunpack.c.l.s8.bf16 %v1173_v32  ;;  %v1183_v32 = vld [vmem:[#allocation5 + $0x1f8] sm:$0xff] }
 0x2ff   :  { %1627 = vmatpush1.bf16.msra.mxu1 %v1332_v11  ;;  %1792 = vmatprep.subr.bf16.mxu0 %v1455_v56  ;;  %v1172_v11 = vld [vmem:[#allocation5 + $0x1a0] sm:$0xff]  ;;  %v1472_v56 = vunpack.c.l.s8.bf16 %v1232_v10 }
 0x300   :  { %1628 = vmatprep.subr.bf16.mxu1 %v1335_v57  ;;  %v1352_v57 = vunpack.c.l.s8.bf16 %v1172_v11  ;;  %v1354_v18 = vunpack.c.h.s8.bf16 %v1172_v11  ;;  %v1182_v11 = vld [vmem:[#allocation5 + $0x1f0] sm:$0xff] }
 0x302   :  { %1793 = vmatpush1.bf16.msra.mxu0 %v1454_v59  ;;  %v1235_v59 = vld [vmem:[#allocation5 + $0x398] sm:$0xff] }
 0x303   :  { %1629 = vmatpush1.bf16.msra.mxu1 %v1334_v31  ;;  %1794 = vmatprep.subr.bf16.mxu0 %v1457_v60  ;;  %v1175_v31 = vld [vmem:[#allocation5 + $0x1b8] sm:$0xff]  ;;  %v1474_v60 = vunpack.c.h.s8.bf16 %v1232_v10  ;;  %v1479_v63 = vunpack.c.h.s8.bf16 %v1235_v59  ;;  %v1242_v10 = vld [vmem:[#allocation5 + $0x3d0] sm:$0xff] }
 0x304   :  { %1630 = vmatprep.subr.bf16.mxu1 %v1337_v13  ;;  %v1477_v13 = vunpack.c.l.s8.bf16 %v1235_v59  ;;  %v1245_v59 = vld [vmem:[#allocation5 + $0x3e8] sm:$0xff] }
 0x306   :  { %1795 = vmatpush1.bf16.msra.mxu0 %v1456_v61  ;;  %v1357_v61 = vunpack.c.l.s8.bf16 %v1175_v31 }
 0x307   :  { %1631 = vmatpush1.bf16.msra.mxu1 %v1336_v22  ;;  %1796 = vmatprep.subr.bf16.mxu0 %v1459_v62  ;;  %v1174_v22 = vld [vmem:[#allocation5 + $0x1b0] sm:$0xff]  ;;  %v1476_v62 = vunpack.c.l.s8.bf16 %v1234_v50 }
 0x308   :  { %1632 = vmatprep.subr.bf16.mxu1 %v1339_v20  ;;  %v1356_v20 = vunpack.c.l.s8.bf16 %v1174_v22 }
 0x30a   :  { %1797 = vmatpush1.bf16.msra.mxu0 %v1458_v44  ;;  %v1177_v44 = vld [vmem:[#allocation5 + $0x1c8] sm:$0xff] }
 0x30b   :  { %1633 = vmatpush1.bf16.msra.mxu1 %v1338_v3  ;;  %1798 = vmatprep.subr.bf16.mxu0 %v1461_v17  ;;  %v1358_v3 = vunpack.c.h.s8.bf16 %v1174_v22  ;;  %v1481_v17 = vunpack.c.l.s8.bf16 %v1237_v26  ;;  %v1247_v22 = vld [vmem:[#allocation5 + $0x3f8] sm:$0xff] }
 0x30c   :  { %1634 = vmatprep.subr.bf16.mxu1 %v1341_v4  ;;  %v1361_v4 = vunpack.c.l.s8.bf16 %v1177_v44 }
 0x30e   :  { %1799 = vmatpush1.bf16.msra.mxu0 %v1460_v27  ;;  %v1480_v27 = vunpack.c.l.s8.bf16 %v1236_v41 }
 0x30f   :  { %1635 = vmatpush1.bf16.msra.mxu1 %v1340_v6  ;;  %1800 = vmatprep.subr.bf16.mxu0 %v1463_v21  ;;  %v1360_v6 = vunpack.c.l.s8.bf16 %v1176_v5  ;;  %v1483_v21 = vunpack.c.h.s8.bf16 %v1237_v26  ;;  %v1503_v26 = vunpack.c.h.s8.bf16 %v1247_v22 }
 0x310   :  { %1636 = vmatprep.subr.bf16.mxu1 %v1343_v19  ;;  %v1363_v19 = vunpack.c.h.s8.bf16 %v1177_v44 }
 0x312   :  { %1801 = vmatpush1.bf16.msra.mxu0 %v1462_v29  ;;  %v1482_v29 = vunpack.c.h.s8.bf16 %v1236_v41 }
 0x313   :  { %1637 = vmatpush1.bf16.msra.mxu1 %v1342_v30  ;;  %1802 = vmatprep.subr.bf16.mxu0 %v1465_v38  ;;  %v1362_v30 = vunpack.c.h.s8.bf16 %v1176_v5  ;;  %v1485_v38 = vunpack.c.l.s8.bf16 %v1239_v23 }
 0x314   :  { %1649 = vmatprep.subr.bf16.mxu1 %v1345_v40  ;;  %v1365_v40 = vunpack.c.l.s8.bf16 %v1179_v39 }
 0x316   :  { %1639 = vmatmul.mubr.bf16.vlgmr.msra.gmra.mrb[20].mxu1 %v2566_v45  ;;  %1803 = vmatpush1.bf16.msra.mxu0 %v1464_v34  ;;  %v1351_v45 = vunpack.c.h.s8.bf16 %v1171_v51  ;;  %v1484_v34 = vunpack.c.l.s8.bf16 %v1238_v43  ;;  %v1181_v51 = vld [vmem:[#allocation5 + $0x1e8] sm:$0xff] }
 0x317   :  { %1650 = vmatpush1.bf16.msra.mxu1 %v1344_v7  ;;  %1681 = vmatprep.mubr.bf16.mxu1 %v2615_v2  ;;  %v1350_v2 = vunpack.c.h.s8.bf16 %v1170_v12  ;;  %v1364_v7 = vunpack.c.l.s8.bf16 %v1178_v15  ;;  %v1180_v12 = vld [vmem:[#allocation5 + $0x1e0] sm:$0xff] }
 0x318   :  { %1804 = vmatprep.subr.bf16.mxu0 %v1467_v48  ;;  %1651 = vmatprep.subr.bf16.mxu1 %v1347_v25  ;;  %v1487_v48 = vunpack.c.h.s8.bf16 %v1239_v23  ;;  %v1367_v25 = vunpack.c.h.s8.bf16 %v1179_v39 }
 0x31a   :  { %1805 = vmatpush1.bf16.msra.mxu0 %v1466_v47  ;;  %v1486_v47 = vunpack.c.h.s8.bf16 %v1238_v43 }
 0x31b   :  { %1652 = vmatpush1.bf16.msra.mxu1 %v1346_v52  ;;  %1806 = vmatprep.subr.bf16.mxu0 %v1469_v16  ;;  %v1366_v52 = vunpack.c.h.s8.bf16 %v1178_v15  ;;  %v1489_v16 = vunpack.c.l.s8.bf16 %v1241_v46 }
 0x31c   :  { %1653 = vmatprep.subr.bf16.mxu1 %v1349_v1  ;;  %v1369_v1 = vunpack.c.l.s8.bf16 %v1181_v51 }
 0x31e   :  { %1807 = vmatpush1.bf16.msra.mxu0 %v1468_v42  ;;  %v1488_v42 = vunpack.c.l.s8.bf16 %v1240_v54 }
 0x31f   :  { %1654 = vmatpush1.bf16.msra.mxu1 %v1348_v55  ;;  %1808 = vmatprep.subr.bf16.mxu0 %v1471_v14  ;;  %v1368_v55 = vunpack.c.l.s8.bf16 %v1180_v12  ;;  %v1491_v14 = vunpack.c.h.s8.bf16 %v1241_v46 }
 0x320   :  { %1655 = vmatprep.subr.bf16.mxu1 %v1351_v45  ;;  %v1371_v45 = vunpack.c.h.s8.bf16 %v1181_v51 }
 0x322   :  { %1809 = vmatpush1.bf16.msra.mxu0 %v1470_v35  ;;  %v1490_v35 = vunpack.c.h.s8.bf16 %v1240_v54 }
 0x323   :  { %1656 = vmatpush1.bf16.msra.mxu1 %v1350_v2  ;;  %1821 = vmatprep.subr.bf16.mxu0 %v1473_v53  ;;  %v1370_v2 = vunpack.c.h.s8.bf16 %v1180_v12  ;;  %v1493_v53 = vunpack.c.l.s8.bf16 %v1243_v33 }
 0x324   :  { %1657 = vmatprep.subr.bf16.mxu1 %v1353_v9  ;;  %v1373_v9 = vunpack.c.l.s8.bf16 %v1183_v32 }
 0x325   :  { %1811 = vmatmul.mubr.bf16.vlgmr.msra.gmra.mrb[16].mxu0 %v2611_v24  ;;  %v1359_v24 = vunpack.c.h.s8.bf16 %v1175_v31  ;;  %v1494_v31 = vunpack.c.h.s8.bf16 %v1242_v10 }
 0x326   :  { %1822 = vmatpush1.bf16.msra.mxu0 %v1472_v56  ;;  %1853 = vmatprep.mubr.bf16.mxu0 %v2637_v8  ;;  %v1478_v8 = vunpack.c.h.s8.bf16 %v1234_v50  ;;  %v1492_v56 = vunpack.c.l.s8.bf16 %v1242_v10 }
 0x327   :  { %1658 = vmatpush1.bf16.msra.mxu1 %v1352_v57  ;;  %1823 = vmatprep.subr.bf16.mxu0 %v1475_v28  ;;  %v1372_v57 = vunpack.c.l.s8.bf16 %v1182_v11  ;;  %v1495_v28 = vunpack.c.h.s8.bf16 %v1243_v33 }
 0x328   :  { %1659 = vmatprep.subr.bf16.mxu1 %v1355_v58  ;;  %v1375_v58 = vunpack.c.h.s8.bf16 %v1183_v32 }
 0x32a   :  { %1824 = vmatpush1.bf16.msra.mxu0 %v1474_v60  ;;  %v1374_v60 = vunpack.c.h.s8.bf16 %v1182_v11 }
 0x32b   :  { %1660 = vmatpush1.bf16.msra.mxu1 %v1354_v18  ;;  %1825 = vmatprep.subr.bf16.mxu0 %v1477_v13  ;;  %v1497_v18 = vunpack.c.l.s8.bf16 %v1245_v59  ;;  %v1244_v13 = vld [vmem:[#allocation5 + $0x3e0] sm:$0xff] }
 0x32c   :  { %1661 = vmatprep.subr.bf16.mxu1 %v1357_v61  ;;  %v1496_v50 = vunpack.c.l.s8.bf16 %v1244_v13  ;;  %v1499_v61 = vunpack.c.h.s8.bf16 %v1245_v59 }
 0x32e   :  { %1826 = vmatpush1.bf16.msra.mxu0 %v1476_v62  ;;  %v1498_v62 = vunpack.c.h.s8.bf16 %v1244_v13 }
 0x32f   :  { %1662 = vmatpush1.bf16.msra.mxu1 %v1356_v20  ;;  %1827 = vmatprep.subr.bf16.mxu0 %v1479_v63  ;;  %v1501_v20 = vunpack.c.l.s8.bf16 %v1247_v22  ;;  %v1246_v63 = vld [vmem:[#allocation5 + $0x3f0] sm:$0xff] }
 0x330   :  { %1663 = vmatprep.subr.bf16.mxu1 %v1359_v24  ;;  %v1500_v24 = vunpack.c.l.s8.bf16 %v1246_v63  ;;  %v1502_v44 = vunpack.c.h.s8.bf16 %v1246_v63 }
 0x332   :  { %1828 = vmatpush1.bf16.msra.mxu0 %v1478_v8 }
 0x333   :  { %1664 = vmatpush1.bf16.msra.mxu1 %v1358_v3  ;;  %1829 = vmatprep.subr.bf16.mxu0 %v1481_v17 }
 0x334   :  { %1665 = vmatprep.subr.bf16.mxu1 %v1361_v4  ;;  %v1880_v4 = vld [vmem:[%s2681_s7] sm:$0x3] }
 0x336   :  { %1830 = vmatpush1.bf16.msra.mxu0 %v1480_v27 }
 0x337   :  { %1666 = vmatpush1.bf16.msra.mxu1 %v1360_v6  ;;  %1831 = vmatprep.subr.bf16.mxu0 %v1483_v21 }
 0x338   :  { %1667 = vmatprep.subr.bf16.mxu1 %v1363_v19 }
 0x33a   :  { %1832 = vmatpush1.bf16.msra.mxu0 %v1482_v29  ;;  %v1889_v29 = vrot.slane %v1880_v4, %v2548_v37 }
 0x33b   :  { %1668 = vmatpush1.bf16.msra.mxu1 %v1362_v30  ;;  %1833 = vmatprep.subr.bf16.mxu0 %v1485_v38 }
 0x33c   :  { %1669 = vmatprep.subr.bf16.mxu1 %v1365_v40 }
 0x33e   :  { %1834 = vmatpush1.bf16.msra.mxu0 %v1484_v34 }
 0x33f   :  { %1670 = vmatpush1.bf16.msra.mxu1 %v1364_v7  ;;  %1835 = vmatprep.subr.bf16.mxu0 %v1487_v48 }
 0x340   :  { %1671 = vmatprep.subr.bf16.mxu1 %v1367_v25 }
 0x342   :  { %1836 = vmatpush1.bf16.msra.mxu0 %v1486_v47 }
 0x343   :  { %1672 = vmatpush1.bf16.msra.mxu1 %v1366_v52  ;;  %1837 = vmatprep.subr.bf16.mxu0 %v1489_v16 }
 0x344   :  { %1673 = vmatprep.subr.bf16.mxu1 %v1369_v1 }
 0x346   :  { %1838 = vmatpush1.bf16.msra.mxu0 %v1488_v42 }
 0x347   :  { %1674 = vmatpush1.bf16.msra.mxu1 %v1368_v55  ;;  %1839 = vmatprep.subr.bf16.mxu0 %v1491_v14 }
 0x348   :  { %1675 = vmatprep.subr.bf16.mxu1 %v1371_v45 }
 0x34a   :  { %1840 = vmatpush1.bf16.msra.mxu0 %v1490_v35 }
 0x34b   :  { %1676 = vmatpush1.bf16.msra.mxu1 %v1370_v2  ;;  %1841 = vmatprep.subr.bf16.mxu0 %v1493_v53 }
 0x34c   :  { %1677 = vmatprep.subr.bf16.mxu1 %v1373_v9 }
 0x34e   :  { %1842 = vmatpush1.bf16.msra.mxu0 %v1492_v56 }
 0x34f   :  { %1678 = vmatpush1.bf16.msra.mxu1 %v1372_v57  ;;  %1843 = vmatprep.subr.bf16.mxu0 %v1495_v28 }
 0x350   :  { %1679 = vmatprep.subr.bf16.mxu1 %v1375_v58 }
 0x352   :  { %1844 = vmatpush1.bf16.msra.mxu0 %v1494_v31 }
 0x353   :  { %1680 = vmatpush1.bf16.msra.mxu1 %v1374_v60  ;;  %1845 = vmatprep.subr.bf16.mxu0 %v1497_v18 }
 0x356   :  { %1682 = vmatmul.mubr.bf16.vlgmr.msra.gmra.mrb[20].mxu1 %v2609_v0  ;;  %1846 = vmatpush1.bf16.msra.mxu0 %v1496_v50  ;;  %v1864_v0 = vld [vmem:[%s2680_s6] sm:$0x3]  ;;  %s2200_s6 = smov [#allocation7]  }
 0x357   :  { %1847 = vmatprep.subr.bf16.mxu0 %v1499_v61  ;;  %v1869_v5 = vrot.slane %v1864_v0, %v2545_v36  ;;  %v1873_v6 = vrot.slane %v1864_v0, %v2548_v37  ;;  %s1937_s7 = sshll.u32 %s2200_s6, 4  ;;  %s1938_s7 = int_to_ptr.vmem [resolvable:$true] %s1937_s7 }
 0x358   :  { %s2157_s9 = scalar_lea.vmem %s1938_s7, 512  ;;  %p2162_p3 = scmp.lt.s32.totalorder %s1938_s7, %s1938_s7 }
 0x359   :  { %p2158_p2 = scmp.ne.s32.totalorder %s1938_s7, %s2157_s9  ;;  %p2163_p4 = scmp.lt.s32.totalorder %s2157_s9, %s2157_s9 }
 0x35a   :  { %1848 = vmatpush1.bf16.msra.mxu0 %v1498_v62 }
 0x35b   :  { %1849 = vmatprep.subr.bf16.mxu0 %v1501_v20  ;;  %p2164_p5 = por %p2163_p4, %p2162_p3 }
 0x35d   :  { %p2165_p6 = pnand %p2164_p5, %p2158_p2 }
 0x35e   :  { %1850 = vmatpush1.bf16.msra.mxu0 %v1500_v24 }
 0x35f   :  { %1851 = vmatprep.subr.bf16.mxu0 %v1503_v26 }
 0x362   :  { %1852 = vmatpush1.bf16.msra.mxu0 %v1502_v44 }
 0x365   :  { %1854 = vmatmul.mubr.bf16.vlgmr.msra.gmra.mrb[16].mxu0 %v2635_v49  ;;  %v1885_v49 = vrot.slane %v1880_v4, %v2545_v36 }
 0x429   :  { %v1683_v8 = vpop.f32.mrb[20].mxu1 }
 0x42a   :  { %v1685_v3 = vpop.f32.mrb[21].mxu1 }
 0x42b   :  { %v1687_v17 = vpop.f32.mrb[22].mxu1 }
 0x42c   :  { %v1689_v41 = vpop.f32.mrb[23].mxu1 }
 0x438   :  { %v1855_v27 = vpop.f32.mrb[16].mxu0 }
 0x439   :  { %v2028_v21 = vadd.f32 %v1855_v27, %v1683_v8  ;;  %v1857_v19 = vpop.f32.mrb[17].mxu0 }
 0x43a   :  { %v2029_v23 = vadd.f32 %v1857_v19, %v1685_v3  ;;  %v1859_v39 = vpop.f32.mrb[18].mxu0 }
 0x43b   :  { %v1876_v30 = vmul.f32 %v2028_v21, %v1869_v5  ;;  %v2030_v38 = vadd.f32 %v1859_v39, %v1687_v17  ;;  %v1861_v43 = vpop.f32.mrb[19].mxu0 }
 0x43c   :  { %v1877_v40 = vmul.f32 %v2029_v23, %v1873_v6  ;;  %v2031_v15 = vadd.f32 %v1861_v43, %v1689_v41 }
 0x43d   :  { %v1878_v34 = vmul.f32 %v2030_v38, %v1869_v5  ;;  %v1892_v7 = vadd.f32 %v1885_v49, %v1876_v30 }
 0x43e   :  { %v1879_v48 = vmul.f32 %v2031_v15, %v1873_v6  ;;  %v1893_v25 = vadd.f32 %v1889_v29, %v1877_v40 }
 0x43f   :  { %v1894_v46 = vadd.f32 %v1885_v49, %v1878_v34 }
 0x440   :  { %v1896_v51 = vmax.f32 %v1892_v7, %v1893_v25  ;;  %v1895_v47 = vadd.f32 %v1889_v29, %v1879_v48 }
 0x442   :  { %1897 = vmax.xlane.f32.xlu0 %v1896_v51  ;;  %v1899_v52 = vmax.f32 %v1894_v46, %v1895_v47 }
 0x444   :  { %1900 = vmax.xlane.f32.xlu1 %v1899_v52 }
 0x4cf   :  { %v1898_v36 = vpop.xlane.xlu0 %1897 }
 0x4d0   :  { %v1902_v16 = vsub.f32 %v1892_v7, %v1898_v36  ;;  %v1903_v54 = vsub.f32 %v1893_v25, %v1898_v36 }
 0x4d1   :  { %v1901_v1 = vpop.xlane.xlu1 %1900 }
 0x4d2   :  { %v1906_v37 = vmul.f32 1.442695, %v1902_v16  ;;  %v1908_v12 = vmul.f32 1.442695, %v1903_v54  ;;  %v1904_v42 = vsub.f32 %v1894_v46, %v1901_v1  ;;  %v1905_v55 = vsub.f32 %v1895_v47, %v1901_v1 }
 0x4d4   :  { %2101 = vpow2.f32 %v1906_v37  ;;  %v1910_v14 = vmul.f32 1.442695, %v1904_v42  ;;  %v1912_v45 = vmul.f32 1.442695, %v1905_v55 }
 0x4d5   :  { %2103 = vpow2.f32 %v1908_v12 }
 0x4d6   :  { %2105 = vpow2.f32 %v1910_v14 }
 0x4d7   :  { %2107 = vpow2.f32 %v1912_v45 }
 0x4de   :  { %v2102_v33 = vpop.eup %2101 }
 0x4df   :  { %v2104_v32 = vpop.eup %2103 }
 0x4e0   :  { %v2106_v35 = vpop.eup %2105  ;;  %v1914_v2 = vadd.f32 %v2104_v32, %v2102_v33 }
 0x4e1   :  { %v2108_v53 = vpop.eup %2107 }
 0x4e2   :  { %1915 = vadd.xlane.f32.xlu0 %v1914_v2  ;;  %v1917_v10 = vadd.f32 %v2108_v53, %v2106_v35 }
 0x4e6   :  { %1918 = vadd.xlane.f32.xlu0 %v1917_v10 }
 0x56f   :  { %v1916_v9 = vpop.xlane.xlu0 %1915 }
 0x570   :  { %2109 = vlog2.f32 %v1916_v9 }
 0x573   :  { %v1919_v11 = vpop.xlane.xlu0 %1918 }
 0x574   :  { %2111 = vlog2.f32 %v1919_v11 }
 0x57a   :  { %v2110_v56 = vpop.eup %2109 }
 0x57b   :  { %v1921_v57 = vmul.f32 0.6931472, %v2110_v56 }
 0x57d   :  { %v1924_v28 = vsub.f32 %v1902_v16, %v1921_v57  ;;  %v1925_v58 = vsub.f32 %v1903_v54, %v1921_v57 }
 0x57e   :  { %v2112_v59 = vpop.eup %2111 }
 0x57f   :  { %1928 = vst [vmem:[#allocation7] sm:$0xff] %v1924_v28  ;;  %1929 = vst [vmem:[#allocation7 + $0x8] sm:$0xff] %v1925_v58  ;;  %v1923_v31 = vmul.f32 0.6931472, %v2112_v59 }
 0x581   :  { %v1926_v60 = vsub.f32 %v1904_v42, %v1923_v31  ;;  %v1927_v18 = vsub.f32 %v1905_v55, %v1923_v31 }
 0x583   :  { %1930 = vst [vmem:[#allocation7 + $0x10] sm:$0xff] %v1926_v60  ;;  %1931 = vst [vmem:[#allocation7 + $0x18] sm:$0xff] %v1927_v18 }
 0x584   :  { %2168 = shalt.err (!%p2165_p6)
}
 0x585   :  { %s2169_s12 = scalar_lea.hbm %s2682_s8, 512 }
 0x586   :  { %p2170_p7 = scmp.ne.s32.totalorder %s2682_s8, %s2169_s12  ;;  %p2173_p8 = scmp.lt.u32.totalorder %s2169_s12, %s2682_s8 }
 0x588   :  { %p2175_p9 = pnand %p2173_p8, %p2170_p7 }
 0x58a   :  { %2178 = shalt.err (!%p2175_p9)
}
 0x58b   :  { %1943 = dma.vmem_to_hbm [thread:$0]  %s1938_s7, 512, %s2682_s8, [#allocation4], %s2189_s2, %s2189_s2, %s2190_s28  }
 0x58c   :  { %2183 = dma.done.wait [#allocation4], 512  }
 0x58d   :  { %2184 = vsyncadd [#allocation4], 4294966784 }
 0x58e   :  { %1947 = vsyncpa [#allocation3], 1 }
 0x58f   :  { %1948 = vsyncpa [#allocation6], 1 }
 0x590   :  { %1949 = vsyncpa [#allocation4], 1 }

</bundles_post_ra>
